<compile_context>
chip_gen: v7x
topology: tpu7x:2x2x1
jax: 0.10.0
libtpu: 0.0.40
codegen_flags: <defaults>
</compile_context>

<pallas_src>
import jax
import jax.numpy as jnp
from jax.experimental import pallas as pl
from jax.experimental.pallas import tpu as pltpu


def sm_kernel(x_ref, w_rec_ref, b_rec_ref, w_head_ref, b_head_ref, out_ref,
              xz_ref):
    """LSTM over T steps + MLP head, fully inside VMEM.

    x_ref      : (T*B, F)      f32, time-major flattened (row = t*B + b)
    w_rec_ref  : (F+2H, 4H)    bf16 = [wx ; zeros(H) ; wh], gate cols [i,f,o,g]
    b_rec_ref  : (1, 4H)       f32, same gate order
    w_head_ref : (L+1, 2H, 2H) bf16 (hidden layers + readout, zero-padded)
    b_head_ref : (L+1, 1, 2H)  f32
    out_ref    : (B, 2H)       f32 (lane-dense padded readout)
    xz_ref     : (T*B, 4H)     f32 VMEM scratch (hoisted input projection)
    """
    B = out_ref.shape[0]
    H2 = out_ref.shape[1]          # 2*H (= 128 for hidden_dim=64)
    H = H2 // 2
    F = x_ref.shape[1]
    T = x_ref.shape[0] // B
    LP1 = w_head_ref.shape[0]      # n_hidden_layers + 1

    # Hoisted input projection for all T steps at once (bias folded in),
    # parked in VMEM scratch so it does not pin ~20 vregs across the
    # statically-unrolled recurrence.
    xz_ref[...] = (
        jnp.dot(x_ref[...].astype(jnp.bfloat16), w_rec_ref[:F, :],
                preferred_element_type=jnp.float32)
        + b_rec_ref[...])

    # Lane predicate for the packed [lo | hi] half layout: full-vreg selects
    # instead of 64-lane misaligned slices.
    lane = jax.lax.broadcasted_iota(jnp.int32, (B, H2), 1)
    is_lo = lane < H

    # Packed state s = [c | h]; c0 = h0 = zeros(1, hidden_dim) broadcast.
    s = jnp.zeros((B, H2), jnp.float32)

    # Statically-unrolled recurrence; only s @ [0;wh] stays on the serial path.
    for t in range(T):
        whz = w_rec_ref[F:, :]                         # (2H, 4H) = [0 ; wh]
        z = xz_ref[pl.ds(t * B, B), :] + jnp.dot(
            s.astype(jnp.bfloat16), whz, preferred_element_type=jnp.float32)
        z1 = z[:, :H2]                                 # [ i | f ]  (aligned)
        z2 = z[:, H2:]                                 # [ o | g ]  (aligned)
        a1 = jax.nn.sigmoid(z1)                                    # [si | sf]
        a2 = jnp.where(is_lo, jax.nn.sigmoid(z2), jnp.tanh(z2))    # [so | tg]
        r1 = pltpu.roll(a1, H, 1)                      # [sf | si]   (XLU slot)
        r2 = pltpu.roll(a2, H, 1)                      # [tg | so]
        tmp = r1 * s + a1 * r2          # lanes 0:H = f*c + i*g = new c
        th = jnp.tanh(tmp)
        hh = a2 * th                    # lanes 0:H = o*tanh(new c) = new h
        s = jnp.where(is_lo, tmp, pltpu.roll(hh, H, 1))   # [new c | new h]

    # MLP head + readout, lane-dense at width 2H throughout; the zero-padded
    # weight rows kill the c half / padded lanes exactly (no lane slicing).
    h = s
    for l in range(LP1 - 1):
        h = jnp.maximum(
            jnp.dot(h.astype(jnp.bfloat16), w_head_ref[l],
                    preferred_element_type=jnp.float32) + b_head_ref[l], 0.0)
    out_ref[...] = (
        jnp.dot(h.astype(jnp.bfloat16), w_head_ref[LP1 - 1],
                preferred_element_type=jnp.float32) + b_head_ref[LP1 - 1])


def pack_params(wx, wh, b, wl, bl, wo, bo):
    """One-time (load-time) parameter massaging: gate reorder, bf16 cast,
    zero-padded lane-dense head weights, concatenated recurrence weights."""
    F, H4 = wx.shape
    H = H4 // 4
    H2 = 2 * H
    L = wl.shape[0]
    O = wo.shape[1]
    assert H2 % 128 == 0, "hidden_dim*2 must be a multiple of 128 lanes"
    assert O <= H2, "out_dim must fit in the 2H-wide lane-dense readout"

    def reorder(w):  # gate columns [i, f, g, o] -> [i, f, o, g]
        wi, wf, wg, wo_ = jnp.split(w, 4, axis=-1)
        return jnp.concatenate([wi, wf, wo_, wg], axis=-1)

    # Recurrence weights: [wx ; zeros(H) ; wh] so the packed state [c|h] can be
    # multiplied directly (c rows hit exact zeros).
    w_rec = jnp.concatenate(
        [reorder(wx), jnp.zeros((H, H4), wx.dtype), reorder(wh)],
        axis=0).astype(jnp.bfloat16)                       # (F+2H, 4H)
    b_rec = reorder(b).astype(jnp.float32)                 # (1, 4H)

    # Head weights stacked into one (L+1, 2H, 2H) buffer.
    w_head = []
    b_head = []
    # layer 0 consumes packed [c|h]: wl[0] goes into rows H:2H.
    w0 = jnp.zeros((H2, H2), jnp.float32).at[H:, :H].set(wl[0])
    w_head.append(w0)
    b_head.append(jnp.pad(bl[0], ((0, 0), (0, H2 - H))))
    for l in range(1, L):
        w_head.append(jnp.zeros((H2, H2), jnp.float32).at[:H, :H].set(wl[l]))
        b_head.append(jnp.pad(bl[l], ((0, 0), (0, H2 - H))))
    w_head.append(jnp.zeros((H2, H2), jnp.float32).at[:H, :O].set(wo))
    b_head.append(jnp.pad(bo, ((0, 0), (0, H2 - O))))
    w_head = jnp.stack(w_head).astype(jnp.bfloat16)        # (L+1, 2H, 2H)
    b_head = jnp.stack(b_head).astype(jnp.float32)         # (L+1, 1, 2H)
    return w_rec, b_rec, w_head, b_head


def sm_forward(x_tbf, w_rec, b_rec, w_head, b_head, out_dim):
    """x_tbf: (T, B, F) time-major.  Packed params from pack_params()."""
    T, B, F = x_tbf.shape
    H4 = b_rec.shape[1]
    H = H4 // 4
    H2 = 2 * H
    L = w_head.shape[0] - 1

    # Flatten to (T*B, F) so the kernel needs no reshape (row = t*B + b).
    x_flat = x_tbf.reshape(T * B, F)

    flops = 2 * (T * B * F * H4 + T * B * H2 * H4 + (L + 1) * B * H2 * H2)
    transcendentals = T * B * 4 * H2
    bytes_accessed = (x_flat.size * 4 + w_rec.size * 2 + b_rec.size * 4 +
                      w_head.size * 2 + b_head.size * 4 + B * H2 * 4)

    vmem = lambda: pl.BlockSpec(memory_space=pltpu.MemorySpace.VMEM)
    out_padded = pl.pallas_call(
        sm_kernel,
        out_shape=jax.ShapeDtypeStruct((B, H2), jnp.float32),
        in_specs=[vmem() for _ in range(5)],
        out_specs=vmem(),
        scratch_shapes=[pltpu.VMEM((T * B, H4), jnp.float32)],
        cost_estimate=pl.CostEstimate(
            flops=flops, transcendentals=transcendentals,
            bytes_accessed=bytes_accessed),
    )(x_flat, w_rec, b_rec, w_head, b_head)
    return out_padded[:, :out_dim]


def sm_reference(x_tbf, wx, wh, b, wl, bl, wo, bo, matmul_dtype=jnp.float32):
    """Pure-JAX reference, original [i,f,g,o] gate order.  matmul_dtype=bf16
    mirrors the kernel's MXU operand precision (f32 accumulation)."""
    T, B, F = x_tbf.shape
    H = wh.shape[0]
    md = matmul_dtype
    dot = lambda a, w: jnp.dot(a.astype(md), w.astype(md),
                               preferred_element_type=jnp.float32)
    h = jnp.zeros((B, H), jnp.float32)
    c = jnp.zeros((B, H), jnp.float32)
    for t in range(T):
        z = (dot(x_tbf[t], wx) + b) + dot(h, wh)
        i = jax.nn.sigmoid(z[:, 0 * H:1 * H])
        f = jax.nn.sigmoid(z[:, 1 * H:2 * H])
        g = jnp.tanh(z[:, 2 * H:3 * H])
        o = jax.nn.sigmoid(z[:, 3 * H:4 * H])
        c = f * c + i * g
        h = o * jnp.tanh(c)
    for l in range(wl.shape[0]):
        h = jnp.maximum(dot(h, wl[l]) + bl[l], 0.0)
    return dot(h, wo) + bo


if __name__ == "__main__":
    # Small shapes consistent with the module's defaults.
    in_dim = 16           # in_shape
    out_dim = 8           # out_shape
    hidden_dim = 64
    n_hidden_layers = 3
    memory_size = 10
    batch = 8

    key = jax.random.PRNGKey(0)
    ks = jax.random.split(key, 8)

    # Deterministic synthetic parameters (no checkpoint loading).
    wx = 0.1 * jax.random.normal(ks[0], (in_dim, 4 * hidden_dim), jnp.float32)
    wh = 0.1 * jax.random.normal(ks[1], (hidden_dim, 4 * hidden_dim), jnp.float32)
    b  = 0.1 * jax.random.normal(ks[2], (1, 4 * hidden_dim), jnp.float32)
    wl = 0.1 * jax.random.normal(ks[3], (n_hidden_layers, hidden_dim, hidden_dim),
                                 jnp.float32)
    bl = 0.1 * jax.random.normal(ks[4], (n_hidden_layers, 1, hidden_dim),
                                 jnp.float32)
    wo = 0.1 * jax.random.normal(ks[5], (hidden_dim, out_dim), jnp.float32)
    bo = 0.1 * jax.random.normal(ks[6], (1, out_dim), jnp.float32)

    # Input: memory_size-long feature window, stored time-major (T, B, F).
    x_tbf = jax.random.normal(ks[7], (memory_size, batch, in_dim), jnp.float32)

    # Parameter packing happens once at load time, outside the per-call path.
    packed = pack_params(wx, wh, b, wl, bl, wo, bo)

    out = sm_forward(x_tbf, *packed, out_dim)
    out = jax.block_until_ready(out)
    assert out.shape == (batch, out_dim)

    # Precision-matched reference (bf16 MXU operands, f32 everywhere else).
    ref_bf16 = sm_reference(x_tbf, wx, wh, b, wl, bl, wo, bo,
                            matmul_dtype=jnp.bfloat16)
    assert jnp.allclose(out, ref_bf16, atol=2e-3, rtol=2e-3)

    # Loose sanity check against the full-f32 reference (bf16 weights compound
    # ~1% relative error over the 10-step recurrence).
    ref_f32 = sm_reference(x_tbf, wx, wh, b, wl, bl, wo, bo,
                           matmul_dtype=jnp.float32)
    assert jnp.allclose(out, ref_f32, atol=5e-2, rtol=5e-2)

    print("KERNEL_OK")
</pallas_src>

<mosaic_0001>
module attributes {stable_mosaic.version = 11 : i64} {
  func.func @sm_kernel(%arg0: memref<80x16xf32, #tpu.memory_space<vmem>>, %arg1: memref<144x256xbf16, #tpu.memory_space<vmem>>, %arg2: memref<1x256xf32, #tpu.memory_space<vmem>>, %arg3: memref<4x128x128xbf16, #tpu.memory_space<vmem>>, %arg4: memref<4x1x128xf32, #tpu.memory_space<vmem>>, %arg5: memref<8x128xf32, #tpu.memory_space<vmem>>, %arg6: memref<80x256xf32, #tpu.memory_space<vmem>>) attributes {dimension_semantics = [], scalar_prefetch = 0 : i64, scratch_operands = 1 : i64, tpu.core_type = #tpu.core_type<tc>} {
    %c0 = arith.constant 0 : index
    %c0_0 = arith.constant 0 : index
    %0 = vector.load %arg0[%c0, %c0_0] : memref<80x16xf32, #tpu.memory_space<vmem>>, vector<80x16xf32>
    %1 = arith.truncf %0 : vector<80x16xf32> to vector<80x16xbf16>
    %c0_1 = arith.constant 0 : index
    %c0_2 = arith.constant 0 : index
    %2 = vector.load %arg1[%c0_1, %c0_2] : memref<144x256xbf16, #tpu.memory_space<vmem>>, vector<16x256xbf16>
    %cst = arith.constant dense<0.000000e+00> : vector<80x256xf32>
    %3 = tpu.matmul %1, %2, %cst {dimension_numbers = #tpu.dot_dimension_numbers<[1], [0], [0], [1], [0, 0, 1, 1], [], []>} : vector<80x16xbf16>, vector<16x256xbf16>, vector<80x256xf32> -> vector<80x256xf32>
    %c0_3 = arith.constant 0 : index
    %c0_4 = arith.constant 0 : index
    %4 = vector.load %arg2[%c0_3, %c0_4] : memref<1x256xf32, #tpu.memory_space<vmem>>, vector<1x256xf32>
    %5 = vector.broadcast %4 : vector<1x256xf32> to vector<80x256xf32>
    %6 = arith.addf %3, %5 : vector<80x256xf32>
    %c0_5 = arith.constant 0 : index
    %c0_6 = arith.constant 0 : index
    %7 = vector.load %arg6[%c0_5, %c0_6] : memref<80x256xf32, #tpu.memory_space<vmem>>, vector<80x256xf32>
    tpu.vector_store %arg6[%c0_5, %c0_6], %6 {strides = array<i32>} : memref<80x256xf32, #tpu.memory_space<vmem>>, vector<80x256xf32>,
    %8 = tpu.iota {dimensions = array<i32: 1>} : vector<8x128xi32>
    %c64_i32 = arith.constant 64 : i32
    %9 = vector.broadcast %c64_i32 : i32 to vector<8x128xi32>
    %10 = arith.cmpi slt, %8, %9 : vector<8x128xi32>
    %cst_7 = arith.constant 0.000000e+00 : f32
    %11 = vector.broadcast %cst_7 : f32 to vector<8x128xf32>
    %c16 = arith.constant 16 : index
    %c0_8 = arith.constant 0 : index
    %12 = vector.load %arg1[%c16, %c0_8] : memref<144x256xbf16, #tpu.memory_space<vmem>>, vector<128x256xbf16>
    %c0_9 = arith.constant 0 : index
    %c0_10 = arith.constant 0 : index
    %13 = vector.load %arg6[%c0_9, %c0_10] : memref<80x256xf32, #tpu.memory_space<vmem>>, vector<8x256xf32>
    %14 = arith.truncf %11 : vector<8x128xf32> to vector<8x128xbf16>
    %cst_11 = arith.constant dense<0.000000e+00> : vector<8x256xf32>
    %15 = tpu.matmul %14, %12, %cst_11 {dimension_numbers = #tpu.dot_dimension_numbers<[1], [0], [0], [1], [0, 0, 1, 1], [], []>} : vector<8x128xbf16>, vector<128x256xbf16>, vector<8x256xf32> -> vector<8x256xf32>
    %16 = arith.addf %13, %15 : vector<8x256xf32>
    %17 = vector.extract_strided_slice %16 {offsets = [0, 0], sizes = [8, 128], strides = [1, 1]} : vector<8x256xf32> to vector<8x128xf32>
    %18 = vector.extract_strided_slice %16 {offsets = [0, 128], sizes = [8, 128], strides = [1, 1]} : vector<8x256xf32> to vector<8x128xf32>
    %19 = arith.negf %17 : vector<8x128xf32>
    %20 = math.exp %19 : vector<8x128xf32>
    %cst_12 = arith.constant 1.000000e+00 : f32
    %21 = vector.broadcast %cst_12 : f32 to vector<8x128xf32>
    %22 = arith.addf %21, %20 : vector<8x128xf32>
    %23 = arith.divf %21, %22 : vector<8x128xf32>
    %24 = arith.negf %18 : vector<8x128xf32>
    %25 = math.exp %24 : vector<8x128xf32>
    %cst_13 = arith.constant 1.000000e+00 : f32
    %26 = vector.broadcast %cst_13 : f32 to vector<8x128xf32>
    %27 = arith.addf %26, %25 : vector<8x128xf32>
    %28 = arith.divf %26, %27 : vector<8x128xf32>
    %29 = math.tanh %18 : vector<8x128xf32>
    %30 = arith.select %10, %28, %29 : vector<8x128xi1>, vector<8x128xf32>
    %c64_i32_14 = arith.constant 64 : i32
    %31 = tpu.dynamic_rotate %23 by %c64_i32_14 dim 1 : vector<8x128xf32>, i32 -> vector<8x128xf32>
    %c64_i32_15 = arith.constant 64 : i32
    %32 = tpu.dynamic_rotate %30 by %c64_i32_15 dim 1 : vector<8x128xf32>, i32 -> vector<8x128xf32>
    %33 = arith.mulf %31, %11 : vector<8x128xf32>
    %34 = arith.mulf %23, %32 : vector<8x128xf32>
    %35 = arith.addf %33, %34 : vector<8x128xf32>
    %36 = math.tanh %35 : vector<8x128xf32>
    %37 = arith.mulf %30, %36 : vector<8x128xf32>
    %c64_i32_16 = arith.constant 64 : i32
    %38 = tpu.dynamic_rotate %37 by %c64_i32_16 dim 1 : vector<8x128xf32>, i32 -> vector<8x128xf32>
    %39 = arith.select %10, %35, %38 : vector<8x128xi1>, vector<8x128xf32>
    %c16_17 = arith.constant 16 : index
    %c0_18 = arith.constant 0 : index
    %40 = vector.load %arg1[%c16_17, %c0_18] : memref<144x256xbf16, #tpu.memory_space<vmem>>, vector<128x256xbf16>
    %c8 = arith.constant 8 : index
    %c0_19 = arith.constant 0 : index
    %41 = vector.load %arg6[%c8, %c0_19] : memref<80x256xf32, #tpu.memory_space<vmem>>, vector<8x256xf32>
    %42 = arith.truncf %39 : vector<8x128xf32> to vector<8x128xbf16>
    %cst_20 = arith.constant dense<0.000000e+00> : vector<8x256xf32>
    %43 = tpu.matmul %42, %40, %cst_20 {dimension_numbers = #tpu.dot_dimension_numbers<[1], [0], [0], [1], [0, 0, 1, 1], [], []>} : vector<8x128xbf16>, vector<128x256xbf16>, vector<8x256xf32> -> vector<8x256xf32>
    %44 = arith.addf %41, %43 : vector<8x256xf32>
    %45 = vector.extract_strided_slice %44 {offsets = [0, 0], sizes = [8, 128], strides = [1, 1]} : vector<8x256xf32> to vector<8x128xf32>
    %46 = vector.extract_strided_slice %44 {offsets = [0, 128], sizes = [8, 128], strides = [1, 1]} : vector<8x256xf32> to vector<8x128xf32>
    %47 = arith.negf %45 : vector<8x128xf32>
    %48 = math.exp %47 : vector<8x128xf32>
    %cst_21 = arith.constant 1.000000e+00 : f32
    %49 = vector.broadcast %cst_21 : f32 to vector<8x128xf32>
    %50 = arith.addf %49, %48 : vector<8x128xf32>
    %51 = arith.divf %49, %50 : vector<8x128xf32>
    %52 = arith.negf %46 : vector<8x128xf32>
    %53 = math.exp %52 : vector<8x128xf32>
    %cst_22 = arith.constant 1.000000e+00 : f32
    %54 = vector.broadcast %cst_22 : f32 to vector<8x128xf32>
    %55 = arith.addf %54, %53 : vector<8x128xf32>
    %56 = arith.divf %54, %55 : vector<8x128xf32>
    %57 = math.tanh %46 : vector<8x128xf32>
    %58 = arith.select %10, %56, %57 : vector<8x128xi1>, vector<8x128xf32>
    %c64_i32_23 = arith.constant 64 : i32
    %59 = tpu.dynamic_rotate %51 by %c64_i32_23 dim 1 : vector<8x128xf32>, i32 -> vector<8x128xf32>
    %c64_i32_24 = arith.constant 64 : i32
    %60 = tpu.dynamic_rotate %58 by %c64_i32_24 dim 1 : vector<8x128xf32>, i32 -> vector<8x128xf32>
    %61 = arith.mulf %59, %39 : vector<8x128xf32>
    %62 = arith.mulf %51, %60 : vector<8x128xf32>
    %63 = arith.addf %61, %62 : vector<8x128xf32>
    %64 = math.tanh %63 : vector<8x128xf32>
    %65 = arith.mulf %58, %64 : vector<8x128xf32>
    %c64_i32_25 = arith.constant 64 : i32
    %66 = tpu.dynamic_rotate %65 by %c64_i32_25 dim 1 : vector<8x128xf32>, i32 -> vector<8x128xf32>
    %67 = arith.select %10, %63, %66 : vector<8x128xi1>, vector<8x128xf32>
    %c16_26 = arith.constant 16 : index
    %c0_27 = arith.constant 0 : index
    %68 = vector.load %arg1[%c16_26, %c0_27] : memref<144x256xbf16, #tpu.memory_space<vmem>>, vector<128x256xbf16>
    %c16_28 = arith.constant 16 : index
    %c0_29 = arith.constant 0 : index
    %69 = vector.load %arg6[%c16_28, %c0_29] : memref<80x256xf32, #tpu.memory_space<vmem>>, vector<8x256xf32>
    %70 = arith.truncf %67 : vector<8x128xf32> to vector<8x128xbf16>
    %cst_30 = arith.constant dense<0.000000e+00> : vector<8x256xf32>
    %71 = tpu.matmul %70, %68, %cst_30 {dimension_numbers = #tpu.dot_dimension_numbers<[1], [0], [0], [1], [0, 0, 1, 1], [], []>} : vector<8x128xbf16>, vector<128x256xbf16>, vector<8x256xf32> -> vector<8x256xf32>
    %72 = arith.addf %69, %71 : vector<8x256xf32>
    %73 = vector.extract_strided_slice %72 {offsets = [0, 0], sizes = [8, 128], strides = [1, 1]} : vector<8x256xf32> to vector<8x128xf32>
    %74 = vector.extract_strided_slice %72 {offsets = [0, 128], sizes = [8, 128], strides = [1, 1]} : vector<8x256xf32> to vector<8x128xf32>
    %75 = arith.negf %73 : vector<8x128xf32>
    %76 = math.exp %75 : vector<8x128xf32>
    %cst_31 = arith.constant 1.000000e+00 : f32
    %77 = vector.broadcast %cst_31 : f32 to vector<8x128xf32>
    %78 = arith.addf %77, %76 : vector<8x128xf32>
    %79 = arith.divf %77, %78 : vector<8x128xf32>
    %80 = arith.negf %74 : vector<8x128xf32>
    %81 = math.exp %80 : vector<8x128xf32>
    %cst_32 = arith.constant 1.000000e+00 : f32
    %82 = vector.broadcast %cst_32 : f32 to vector<8x128xf32>
    %83 = arith.addf %82, %81 : vector<8x128xf32>
    %84 = arith.divf %82, %83 : vector<8x128xf32>
    %85 = math.tanh %74 : vector<8x128xf32>
    %86 = arith.select %10, %84, %85 : vector<8x128xi1>, vector<8x128xf32>
    %c64_i32_33 = arith.constant 64 : i32
    %87 = tpu.dynamic_rotate %79 by %c64_i32_33 dim 1 : vector<8x128xf32>, i32 -> vector<8x128xf32>
    %c64_i32_34 = arith.constant 64 : i32
    %88 = tpu.dynamic_rotate %86 by %c64_i32_34 dim 1 : vector<8x128xf32>, i32 -> vector<8x128xf32>
    %89 = arith.mulf %87, %67 : vector<8x128xf32>
    %90 = arith.mulf %79, %88 : vector<8x128xf32>
    %91 = arith.addf %89, %90 : vector<8x128xf32>
    %92 = math.tanh %91 : vector<8x128xf32>
    %93 = arith.mulf %86, %92 : vector<8x128xf32>
    %c64_i32_35 = arith.constant 64 : i32
    %94 = tpu.dynamic_rotate %93 by %c64_i32_35 dim 1 : vector<8x128xf32>, i32 -> vector<8x128xf32>
    %95 = arith.select %10, %91, %94 : vector<8x128xi1>, vector<8x128xf32>
    %c16_36 = arith.constant 16 : index
    %c0_37 = arith.constant 0 : index
    %96 = vector.load %arg1[%c16_36, %c0_37] : memref<144x256xbf16, #tpu.memory_space<vmem>>, vector<128x256xbf16>
    %c24 = arith.constant 24 : index
    %c0_38 = arith.constant 0 : index
    %97 = vector.load %arg6[%c24, %c0_38] : memref<80x256xf32, #tpu.memory_space<vmem>>, vector<8x256xf32>
    %98 = arith.truncf %95 : vector<8x128xf32> to vector<8x128xbf16>
    %cst_39 = arith.constant dense<0.000000e+00> : vector<8x256xf32>
    %99 = tpu.matmul %98, %96, %cst_39 {dimension_numbers = #tpu.dot_dimension_numbers<[1], [0], [0], [1], [0, 0, 1, 1], [], []>} : vector<8x128xbf16>, vector<128x256xbf16>, vector<8x256xf32> -> vector<8x256xf32>
    %100 = arith.addf %97, %99 : vector<8x256xf32>
    %101 = vector.extract_strided_slice %100 {offsets = [0, 0], sizes = [8, 128], strides = [1, 1]} : vector<8x256xf32> to vector<8x128xf32>
    %102 = vector.extract_strided_slice %100 {offsets = [0, 128], sizes = [8, 128], strides = [1, 1]} : vector<8x256xf32> to vector<8x128xf32>
    %103 = arith.negf %101 : vector<8x128xf32>
    %104 = math.exp %103 : vector<8x128xf32>
    %cst_40 = arith.constant 1.000000e+00 : f32
    %105 = vector.broadcast %cst_40 : f32 to vector<8x128xf32>
    %106 = arith.addf %105, %104 : vector<8x128xf32>
    %107 = arith.divf %105, %106 : vector<8x128xf32>
    %108 = arith.negf %102 : vector<8x128xf32>
    %109 = math.exp %108 : vector<8x128xf32>
    %cst_41 = arith.constant 1.000000e+00 : f32
    %110 = vector.broadcast %cst_41 : f32 to vector<8x128xf32>
    %111 = arith.addf %110, %109 : vector<8x128xf32>
    %112 = arith.divf %110, %111 : vector<8x128xf32>
    %113 = math.tanh %102 : vector<8x128xf32>
    %114 = arith.select %10, %112, %113 : vector<8x128xi1>, vector<8x128xf32>
    %c64_i32_42 = arith.constant 64 : i32
    %115 = tpu.dynamic_rotate %107 by %c64_i32_42 dim 1 : vector<8x128xf32>, i32 -> vector<8x128xf32>
    %c64_i32_43 = arith.constant 64 : i32
    %116 = tpu.dynamic_rotate %114 by %c64_i32_43 dim 1 : vector<8x128xf32>, i32 -> vector<8x128xf32>
    %117 = arith.mulf %115, %95 : vector<8x128xf32>
    %118 = arith.mulf %107, %116 : vector<8x128xf32>
    %119 = arith.addf %117, %118 : vector<8x128xf32>
    %120 = math.tanh %119 : vector<8x128xf32>
    %121 = arith.mulf %114, %120 : vector<8x128xf32>
    %c64_i32_44 = arith.constant 64 : i32
    %122 = tpu.dynamic_rotate %121 by %c64_i32_44 dim 1 : vector<8x128xf32>, i32 -> vector<8x128xf32>
    %123 = arith.select %10, %119, %122 : vector<8x128xi1>, vector<8x128xf32>
    %c16_45 = arith.constant 16 : index
    %c0_46 = arith.constant 0 : index
    %124 = vector.load %arg1[%c16_45, %c0_46] : memref<144x256xbf16, #tpu.memory_space<vmem>>, vector<128x256xbf16>
    %c32 = arith.constant 32 : index
    %c0_47 = arith.constant 0 : index
    %125 = vector.load %arg6[%c32, %c0_47] : memref<80x256xf32, #tpu.memory_space<vmem>>, vector<8x256xf32>
    %126 = arith.truncf %123 : vector<8x128xf32> to vector<8x128xbf16>
    %cst_48 = arith.constant dense<0.000000e+00> : vector<8x256xf32>
    %127 = tpu.matmul %126, %124, %cst_48 {dimension_numbers = #tpu.dot_dimension_numbers<[1], [0], [0], [1], [0, 0, 1, 1], [], []>} : vector<8x128xbf16>, vector<128x256xbf16>, vector<8x256xf32> -> vector<8x256xf32>
    %128 = arith.addf %125, %127 : vector<8x256xf32>
    %129 = vector.extract_strided_slice %128 {offsets = [0, 0], sizes = [8, 128], strides = [1, 1]} : vector<8x256xf32> to vector<8x128xf32>
    %130 = vector.extract_strided_slice %128 {offsets = [0, 128], sizes = [8, 128], strides = [1, 1]} : vector<8x256xf32> to vector<8x128xf32>
    %131 = arith.negf %129 : vector<8x128xf32>
    %132 = math.exp %131 : vector<8x128xf32>
    %cst_49 = arith.constant 1.000000e+00 : f32
    %133 = vector.broadcast %cst_49 : f32 to vector<8x128xf32>
    %134 = arith.addf %133, %132 : vector<8x128xf32>
    %135 = arith.divf %133, %134 : vector<8x128xf32>
    %136 = arith.negf %130 : vector<8x128xf32>
    %137 = math.exp %136 : vector<8x128xf32>
    %cst_50 = arith.constant 1.000000e+00 : f32
    %138 = vector.broadcast %cst_50 : f32 to vector<8x128xf32>
    %139 = arith.addf %138, %137 : vector<8x128xf32>
    %140 = arith.divf %138, %139 : vector<8x128xf32>
    %141 = math.tanh %130 : vector<8x128xf32>
    %142 = arith.select %10, %140, %141 : vector<8x128xi1>, vector<8x128xf32>
    %c64_i32_51 = arith.constant 64 : i32
    %143 = tpu.dynamic_rotate %135 by %c64_i32_51 dim 1 : vector<8x128xf32>, i32 -> vector<8x128xf32>
    %c64_i32_52 = arith.constant 64 : i32
    %144 = tpu.dynamic_rotate %142 by %c64_i32_52 dim 1 : vector<8x128xf32>, i32 -> vector<8x128xf32>
    %145 = arith.mulf %143, %123 : vector<8x128xf32>
    %146 = arith.mulf %135, %144 : vector<8x128xf32>
    %147 = arith.addf %145, %146 : vector<8x128xf32>
    %148 = math.tanh %147 : vector<8x128xf32>
    %149 = arith.mulf %142, %148 : vector<8x128xf32>
    %c64_i32_53 = arith.constant 64 : i32
    %150 = tpu.dynamic_rotate %149 by %c64_i32_53 dim 1 : vector<8x128xf32>, i32 -> vector<8x128xf32>
    %151 = arith.select %10, %147, %150 : vector<8x128xi1>, vector<8x128xf32>
    %c16_54 = arith.constant 16 : index
    %c0_55 = arith.constant 0 : index
    %152 = vector.load %arg1[%c16_54, %c0_55] : memref<144x256xbf16, #tpu.memory_space<vmem>>, vector<128x256xbf16>
    %c40 = arith.constant 40 : index
    %c0_56 = arith.constant 0 : index
    %153 = vector.load %arg6[%c40, %c0_56] : memref<80x256xf32, #tpu.memory_space<vmem>>, vector<8x256xf32>
    %154 = arith.truncf %151 : vector<8x128xf32> to vector<8x128xbf16>
    %cst_57 = arith.constant dense<0.000000e+00> : vector<8x256xf32>
    %155 = tpu.matmul %154, %152, %cst_57 {dimension_numbers = #tpu.dot_dimension_numbers<[1], [0], [0], [1], [0, 0, 1, 1], [], []>} : vector<8x128xbf16>, vector<128x256xbf16>, vector<8x256xf32> -> vector<8x256xf32>
    %156 = arith.addf %153, %155 : vector<8x256xf32>
    %157 = vector.extract_strided_slice %156 {offsets = [0, 0], sizes = [8, 128], strides = [1, 1]} : vector<8x256xf32> to vector<8x128xf32>
    %158 = vector.extract_strided_slice %156 {offsets = [0, 128], sizes = [8, 128], strides = [1, 1]} : vector<8x256xf32> to vector<8x128xf32>
    %159 = arith.negf %157 : vector<8x128xf32>
    %160 = math.exp %159 : vector<8x128xf32>
    %cst_58 = arith.constant 1.000000e+00 : f32
    %161 = vector.broadcast %cst_58 : f32 to vector<8x128xf32>
    %162 = arith.addf %161, %160 : vector<8x128xf32>
    %163 = arith.divf %161, %162 : vector<8x128xf32>
    %164 = arith.negf %158 : vector<8x128xf32>
    %165 = math.exp %164 : vector<8x128xf32>
    %cst_59 = arith.constant 1.000000e+00 : f32
    %166 = vector.broadcast %cst_59 : f32 to vector<8x128xf32>
    %167 = arith.addf %166, %165 : vector<8x128xf32>
    %168 = arith.divf %166, %167 : vector<8x128xf32>
    %169 = math.tanh %158 : vector<8x128xf32>
    %170 = arith.select %10, %168, %169 : vector<8x128xi1>, vector<8x128xf32>
    %c64_i32_60 = arith.constant 64 : i32
    %171 = tpu.dynamic_rotate %163 by %c64_i32_60 dim 1 : vector<8x128xf32>, i32 -> vector<8x128xf32>
    %c64_i32_61 = arith.constant 64 : i32
    %172 = tpu.dynamic_rotate %170 by %c64_i32_61 dim 1 : vector<8x128xf32>, i32 -> vector<8x128xf32>
    %173 = arith.mulf %171, %151 : vector<8x128xf32>
    %174 = arith.mulf %163, %172 : vector<8x128xf32>
    %175 = arith.addf %173, %174 : vector<8x128xf32>
    %176 = math.tanh %175 : vector<8x128xf32>
    %177 = arith.mulf %170, %176 : vector<8x128xf32>
    %c64_i32_62 = arith.constant 64 : i32
    %178 = tpu.dynamic_rotate %177 by %c64_i32_62 dim 1 : vector<8x128xf32>, i32 -> vector<8x128xf32>
    %179 = arith.select %10, %175, %178 : vector<8x128xi1>, vector<8x128xf32>
    %c16_63 = arith.constant 16 : index
    %c0_64 = arith.constant 0 : index
    %180 = vector.load %arg1[%c16_63, %c0_64] : memref<144x256xbf16, #tpu.memory_space<vmem>>, vector<128x256xbf16>
    %c48 = arith.constant 48 : index
    %c0_65 = arith.constant 0 : index
    %181 = vector.load %arg6[%c48, %c0_65] : memref<80x256xf32, #tpu.memory_space<vmem>>, vector<8x256xf32>
    %182 = arith.truncf %179 : vector<8x128xf32> to vector<8x128xbf16>
    %cst_66 = arith.constant dense<0.000000e+00> : vector<8x256xf32>
    %183 = tpu.matmul %182, %180, %cst_66 {dimension_numbers = #tpu.dot_dimension_numbers<[1], [0], [0], [1], [0, 0, 1, 1], [], []>} : vector<8x128xbf16>, vector<128x256xbf16>, vector<8x256xf32> -> vector<8x256xf32>
    %184 = arith.addf %181, %183 : vector<8x256xf32>
    %185 = vector.extract_strided_slice %184 {offsets = [0, 0], sizes = [8, 128], strides = [1, 1]} : vector<8x256xf32> to vector<8x128xf32>
    %186 = vector.extract_strided_slice %184 {offsets = [0, 128], sizes = [8, 128], strides = [1, 1]} : vector<8x256xf32> to vector<8x128xf32>
    %187 = arith.negf %185 : vector<8x128xf32>
    %188 = math.exp %187 : vector<8x128xf32>
    %cst_67 = arith.constant 1.000000e+00 : f32
    %189 = vector.broadcast %cst_67 : f32 to vector<8x128xf32>
    %190 = arith.addf %189, %188 : vector<8x128xf32>
    %191 = arith.divf %189, %190 : vector<8x128xf32>
    %192 = arith.negf %186 : vector<8x128xf32>
    %193 = math.exp %192 : vector<8x128xf32>
    %cst_68 = arith.constant 1.000000e+00 : f32
    %194 = vector.broadcast %cst_68 : f32 to vector<8x128xf32>
    %195 = arith.addf %194, %193 : vector<8x128xf32>
    %196 = arith.divf %194, %195 : vector<8x128xf32>
    %197 = math.tanh %186 : vector<8x128xf32>
    %198 = arith.select %10, %196, %197 : vector<8x128xi1>, vector<8x128xf32>
    %c64_i32_69 = arith.constant 64 : i32
    %199 = tpu.dynamic_rotate %191 by %c64_i32_69 dim 1 : vector<8x128xf32>, i32 -> vector<8x128xf32>
    %c64_i32_70 = arith.constant 64 : i32
    %200 = tpu.dynamic_rotate %198 by %c64_i32_70 dim 1 : vector<8x128xf32>, i32 -> vector<8x128xf32>
    %201 = arith.mulf %199, %179 : vector<8x128xf32>
    %202 = arith.mulf %191, %200 : vector<8x128xf32>
    %203 = arith.addf %201, %202 : vector<8x128xf32>
    %204 = math.tanh %203 : vector<8x128xf32>
    %205 = arith.mulf %198, %204 : vector<8x128xf32>
    %c64_i32_71 = arith.constant 64 : i32
    %206 = tpu.dynamic_rotate %205 by %c64_i32_71 dim 1 : vector<8x128xf32>, i32 -> vector<8x128xf32>
    %207 = arith.select %10, %203, %206 : vector<8x128xi1>, vector<8x128xf32>
    %c16_72 = arith.constant 16 : index
    %c0_73 = arith.constant 0 : index
    %208 = vector.load %arg1[%c16_72, %c0_73] : memref<144x256xbf16, #tpu.memory_space<vmem>>, vector<128x256xbf16>
    %c56 = arith.constant 56 : index
    %c0_74 = arith.constant 0 : index
    %209 = vector.load %arg6[%c56, %c0_74] : memref<80x256xf32, #tpu.memory_space<vmem>>, vector<8x256xf32>
    %210 = arith.truncf %207 : vector<8x128xf32> to vector<8x128xbf16>
    %cst_75 = arith.constant dense<0.000000e+00> : vector<8x256xf32>
    %211 = tpu.matmul %210, %208, %cst_75 {dimension_numbers = #tpu.dot_dimension_numbers<[1], [0], [0], [1], [0, 0, 1, 1], [], []>} : vector<8x128xbf16>, vector<128x256xbf16>, vector<8x256xf32> -> vector<8x256xf32>
    %212 = arith.addf %209, %211 : vector<8x256xf32>
    %213 = vector.extract_strided_slice %212 {offsets = [0, 0], sizes = [8, 128], strides = [1, 1]} : vector<8x256xf32> to vector<8x128xf32>
    %214 = vector.extract_strided_slice %212 {offsets = [0, 128], sizes = [8, 128], strides = [1, 1]} : vector<8x256xf32> to vector<8x128xf32>
    %215 = arith.negf %213 : vector<8x128xf32>
    %216 = math.exp %215 : vector<8x128xf32>
    %cst_76 = arith.constant 1.000000e+00 : f32
    %217 = vector.broadcast %cst_76 : f32 to vector<8x128xf32>
    %218 = arith.addf %217, %216 : vector<8x128xf32>
    %219 = arith.divf %217, %218 : vector<8x128xf32>
    %220 = arith.negf %214 : vector<8x128xf32>
    %221 = math.exp %220 : vector<8x128xf32>
    %cst_77 = arith.constant 1.000000e+00 : f32
    %222 = vector.broadcast %cst_77 : f32 to vector<8x128xf32>
    %223 = arith.addf %222, %221 : vector<8x128xf32>
    %224 = arith.divf %222, %223 : vector<8x128xf32>
    %225 = math.tanh %214 : vector<8x128xf32>
    %226 = arith.select %10, %224, %225 : vector<8x128xi1>, vector<8x128xf32>
    %c64_i32_78 = arith.constant 64 : i32
    %227 = tpu.dynamic_rotate %219 by %c64_i32_78 dim 1 : vector<8x128xf32>, i32 -> vector<8x128xf32>
    %c64_i32_79 = arith.constant 64 : i32
    %228 = tpu.dynamic_rotate %226 by %c64_i32_79 dim 1 : vector<8x128xf32>, i32 -> vector<8x128xf32>
    %229 = arith.mulf %227, %207 : vector<8x128xf32>
    %230 = arith.mulf %219, %228 : vector<8x128xf32>
    %231 = arith.addf %229, %230 : vector<8x128xf32>
    %232 = math.tanh %231 : vector<8x128xf32>
    %233 = arith.mulf %226, %232 : vector<8x128xf32>
    %c64_i32_80 = arith.constant 64 : i32
    %234 = tpu.dynamic_rotate %233 by %c64_i32_80 dim 1 : vector<8x128xf32>, i32 -> vector<8x128xf32>
    %235 = arith.select %10, %231, %234 : vector<8x128xi1>, vector<8x128xf32>
    %c16_81 = arith.constant 16 : index
    %c0_82 = arith.constant 0 : index
    %236 = vector.load %arg1[%c16_81, %c0_82] : memref<144x256xbf16, #tpu.memory_space<vmem>>, vector<128x256xbf16>
    %c64 = arith.constant 64 : index
    %c0_83 = arith.constant 0 : index
    %237 = vector.load %arg6[%c64, %c0_83] : memref<80x256xf32, #tpu.memory_space<vmem>>, vector<8x256xf32>
    %238 = arith.truncf %235 : vector<8x128xf32> to vector<8x128xbf16>
    %cst_84 = arith.constant dense<0.000000e+00> : vector<8x256xf32>
    %239 = tpu.matmul %238, %236, %cst_84 {dimension_numbers = #tpu.dot_dimension_numbers<[1], [0], [0], [1], [0, 0, 1, 1], [], []>} : vector<8x128xbf16>, vector<128x256xbf16>, vector<8x256xf32> -> vector<8x256xf32>
    %240 = arith.addf %237, %239 : vector<8x256xf32>
    %241 = vector.extract_strided_slice %240 {offsets = [0, 0], sizes = [8, 128], strides = [1, 1]} : vector<8x256xf32> to vector<8x128xf32>
    %242 = vector.extract_strided_slice %240 {offsets = [0, 128], sizes = [8, 128], strides = [1, 1]} : vector<8x256xf32> to vector<8x128xf32>
    %243 = arith.negf %241 : vector<8x128xf32>
    %244 = math.exp %243 : vector<8x128xf32>
    %cst_85 = arith.constant 1.000000e+00 : f32
    %245 = vector.broadcast %cst_85 : f32 to vector<8x128xf32>
    %246 = arith.addf %245, %244 : vector<8x128xf32>
    %247 = arith.divf %245, %246 : vector<8x128xf32>
    %248 = arith.negf %242 : vector<8x128xf32>
    %249 = math.exp %248 : vector<8x128xf32>
    %cst_86 = arith.constant 1.000000e+00 : f32
    %250 = vector.broadcast %cst_86 : f32 to vector<8x128xf32>
    %251 = arith.addf %250, %249 : vector<8x128xf32>
    %252 = arith.divf %250, %251 : vector<8x128xf32>
    %253 = math.tanh %242 : vector<8x128xf32>
    %254 = arith.select %10, %252, %253 : vector<8x128xi1>, vector<8x128xf32>
    %c64_i32_87 = arith.constant 64 : i32
    %255 = tpu.dynamic_rotate %247 by %c64_i32_87 dim 1 : vector<8x128xf32>, i32 -> vector<8x128xf32>
    %c64_i32_88 = arith.constant 64 : i32
    %256 = tpu.dynamic_rotate %254 by %c64_i32_88 dim 1 : vector<8x128xf32>, i32 -> vector<8x128xf32>
    %257 = arith.mulf %255, %235 : vector<8x128xf32>
    %258 = arith.mulf %247, %256 : vector<8x128xf32>
    %259 = arith.addf %257, %258 : vector<8x128xf32>
    %260 = math.tanh %259 : vector<8x128xf32>
    %261 = arith.mulf %254, %260 : vector<8x128xf32>
    %c64_i32_89 = arith.constant 64 : i32
    %262 = tpu.dynamic_rotate %261 by %c64_i32_89 dim 1 : vector<8x128xf32>, i32 -> vector<8x128xf32>
    %263 = arith.select %10, %259, %262 : vector<8x128xi1>, vector<8x128xf32>
    %c16_90 = arith.constant 16 : index
    %c0_91 = arith.constant 0 : index
    %264 = vector.load %arg1[%c16_90, %c0_91] : memref<144x256xbf16, #tpu.memory_space<vmem>>, vector<128x256xbf16>
    %c72 = arith.constant 72 : index
    %c0_92 = arith.constant 0 : index
    %265 = vector.load %arg6[%c72, %c0_92] : memref<80x256xf32, #tpu.memory_space<vmem>>, vector<8x256xf32>
    %266 = arith.truncf %263 : vector<8x128xf32> to vector<8x128xbf16>
    %cst_93 = arith.constant dense<0.000000e+00> : vector<8x256xf32>
    %267 = tpu.matmul %266, %264, %cst_93 {dimension_numbers = #tpu.dot_dimension_numbers<[1], [0], [0], [1], [0, 0, 1, 1], [], []>} : vector<8x128xbf16>, vector<128x256xbf16>, vector<8x256xf32> -> vector<8x256xf32>
    %268 = arith.addf %265, %267 : vector<8x256xf32>
    %269 = vector.extract_strided_slice %268 {offsets = [0, 0], sizes = [8, 128], strides = [1, 1]} : vector<8x256xf32> to vector<8x128xf32>
    %270 = vector.extract_strided_slice %268 {offsets = [0, 128], sizes = [8, 128], strides = [1, 1]} : vector<8x256xf32> to vector<8x128xf32>
    %271 = arith.negf %269 : vector<8x128xf32>
    %272 = math.exp %271 : vector<8x128xf32>
    %cst_94 = arith.constant 1.000000e+00 : f32
    %273 = vector.broadcast %cst_94 : f32 to vector<8x128xf32>
    %274 = arith.addf %273, %272 : vector<8x128xf32>
    %275 = arith.divf %273, %274 : vector<8x128xf32>
    %276 = arith.negf %270 : vector<8x128xf32>
    %277 = math.exp %276 : vector<8x128xf32>
    %cst_95 = arith.constant 1.000000e+00 : f32
    %278 = vector.broadcast %cst_95 : f32 to vector<8x128xf32>
    %279 = arith.addf %278, %277 : vector<8x128xf32>
    %280 = arith.divf %278, %279 : vector<8x128xf32>
    %281 = math.tanh %270 : vector<8x128xf32>
    %282 = arith.select %10, %280, %281 : vector<8x128xi1>, vector<8x128xf32>
    %c64_i32_96 = arith.constant 64 : i32
    %283 = tpu.dynamic_rotate %275 by %c64_i32_96 dim 1 : vector<8x128xf32>, i32 -> vector<8x128xf32>
    %c64_i32_97 = arith.constant 64 : i32
    %284 = tpu.dynamic_rotate %282 by %c64_i32_97 dim 1 : vector<8x128xf32>, i32 -> vector<8x128xf32>
    %285 = arith.mulf %283, %263 : vector<8x128xf32>
    %286 = arith.mulf %275, %284 : vector<8x128xf32>
    %287 = arith.addf %285, %286 : vector<8x128xf32>
    %288 = math.tanh %287 : vector<8x128xf32>
    %289 = arith.mulf %282, %288 : vector<8x128xf32>
    %c64_i32_98 = arith.constant 64 : i32
    %290 = tpu.dynamic_rotate %289 by %c64_i32_98 dim 1 : vector<8x128xf32>, i32 -> vector<8x128xf32>
    %291 = arith.select %10, %287, %290 : vector<8x128xi1>, vector<8x128xf32>
    %292 = arith.truncf %291 : vector<8x128xf32> to vector<8x128xbf16>
    %c0_99 = arith.constant 0 : index
    %c0_100 = arith.constant 0 : index
    %c0_101 = arith.constant 0 : index
    %293 = vector.load %arg3[%c0_99, %c0_100, %c0_101] : memref<4x128x128xbf16, #tpu.memory_space<vmem>>, vector<1x128x128xbf16>
    %294 = vector.shape_cast %293 : vector<1x128x128xbf16> to vector<128x128xbf16>
    %cst_102 = arith.constant dense<0.000000e+00> : vector<8x128xf32>
    %295 = tpu.matmul %292, %294, %cst_102 {dimension_numbers = #tpu.dot_dimension_numbers<[1], [0], [0], [1], [0, 0, 1, 1], [], []>} : vector<8x128xbf16>, vector<128x128xbf16>, vector<8x128xf32> -> vector<8x128xf32>
    %c0_103 = arith.constant 0 : index
    %c0_104 = arith.constant 0 : index
    %c0_105 = arith.constant 0 : index
    %296 = vector.load %arg4[%c0_103, %c0_104, %c0_105] : memref<4x1x128xf32, #tpu.memory_space<vmem>>, vector<1x1x128xf32>
    %297 = vector.shape_cast %296 : vector<1x1x128xf32> to vector<1x128xf32>
    %298 = vector.broadcast %297 : vector<1x128xf32> to vector<8x128xf32>
    %299 = arith.addf %295, %298 : vector<8x128xf32>
    %cst_106 = arith.constant 0.000000e+00 : f32
    %300 = vector.broadcast %cst_106 : f32 to vector<8x128xf32>
    %301 = arith.maximumf %299, %300 : vector<8x128xf32>
    %302 = arith.truncf %301 : vector<8x128xf32> to vector<8x128xbf16>
    %c1 = arith.constant 1 : index
    %c0_107 = arith.constant 0 : index
    %c0_108 = arith.constant 0 : index
    %303 = vector.load %arg3[%c1, %c0_107, %c0_108] : memref<4x128x128xbf16, #tpu.memory_space<vmem>>, vector<1x128x128xbf16>
    %304 = vector.shape_cast %303 : vector<1x128x128xbf16> to vector<128x128xbf16>
    %cst_109 = arith.constant dense<0.000000e+00> : vector<8x128xf32>
    %305 = tpu.matmul %302, %304, %cst_109 {dimension_numbers = #tpu.dot_dimension_numbers<[1], [0], [0], [1], [0, 0, 1, 1], [], []>} : vector<8x128xbf16>, vector<128x128xbf16>, vector<8x128xf32> -> vector<8x128xf32>
    %c1_110 = arith.constant 1 : index
    %c0_111 = arith.constant 0 : index
    %c0_112 = arith.constant 0 : index
    %306 = vector.load %arg4[%c1_110, %c0_111, %c0_112] : memref<4x1x128xf32, #tpu.memory_space<vmem>>, vector<1x1x128xf32>
    %307 = vector.shape_cast %306 : vector<1x1x128xf32> to vector<1x128xf32>
    %308 = vector.broadcast %307 : vector<1x128xf32> to vector<8x128xf32>
    %309 = arith.addf %305, %308 : vector<8x128xf32>
    %cst_113 = arith.constant 0.000000e+00 : f32
    %310 = vector.broadcast %cst_113 : f32 to vector<8x128xf32>
    %311 = arith.maximumf %309, %310 : vector<8x128xf32>
    %312 = arith.truncf %311 : vector<8x128xf32> to vector<8x128xbf16>
    %c2 = arith.constant 2 : index
    %c0_114 = arith.constant 0 : index
    %c0_115 = arith.constant 0 : index
    %313 = vector.load %arg3[%c2, %c0_114, %c0_115] : memref<4x128x128xbf16, #tpu.memory_space<vmem>>, vector<1x128x128xbf16>
    %314 = vector.shape_cast %313 : vector<1x128x128xbf16> to vector<128x128xbf16>
    %cst_116 = arith.constant dense<0.000000e+00> : vector<8x128xf32>
    %315 = tpu.matmul %312, %314, %cst_116 {dimension_numbers = #tpu.dot_dimension_numbers<[1], [0], [0], [1], [0, 0, 1, 1], [], []>} : vector<8x128xbf16>, vector<128x128xbf16>, vector<8x128xf32> -> vector<8x128xf32>
    %c2_117 = arith.constant 2 : index
    %c0_118 = arith.constant 0 : index
    %c0_119 = arith.constant 0 : index
    %316 = vector.load %arg4[%c2_117, %c0_118, %c0_119] : memref<4x1x128xf32, #tpu.memory_space<vmem>>, vector<1x1x128xf32>
    %317 = vector.shape_cast %316 : vector<1x1x128xf32> to vector<1x128xf32>
    %318 = vector.broadcast %317 : vector<1x128xf32> to vector<8x128xf32>
    %319 = arith.addf %315, %318 : vector<8x128xf32>
    %cst_120 = arith.constant 0.000000e+00 : f32
    %320 = vector.broadcast %cst_120 : f32 to vector<8x128xf32>
    %321 = arith.maximumf %319, %320 : vector<8x128xf32>
    %322 = arith.truncf %321 : vector<8x128xf32> to vector<8x128xbf16>
    %c3 = arith.constant 3 : index
    %c0_121 = arith.constant 0 : index
    %c0_122 = arith.constant 0 : index
    %323 = vector.load %arg3[%c3, %c0_121, %c0_122] : memref<4x128x128xbf16, #tpu.memory_space<vmem>>, vector<1x128x128xbf16>
    %324 = vector.shape_cast %323 : vector<1x128x128xbf16> to vector<128x128xbf16>
    %cst_123 = arith.constant dense<0.000000e+00> : vector<8x128xf32>
    %325 = tpu.matmul %322, %324, %cst_123 {dimension_numbers = #tpu.dot_dimension_numbers<[1], [0], [0], [1], [0, 0, 1, 1], [], []>} : vector<8x128xbf16>, vector<128x128xbf16>, vector<8x128xf32> -> vector<8x128xf32>
    %c3_124 = arith.constant 3 : index
    %c0_125 = arith.constant 0 : index
    %c0_126 = arith.constant 0 : index
    %326 = vector.load %arg4[%c3_124, %c0_125, %c0_126] : memref<4x1x128xf32, #tpu.memory_space<vmem>>, vector<1x1x128xf32>
    %327 = vector.shape_cast %326 : vector<1x1x128xf32> to vector<1x128xf32>
    %328 = vector.broadcast %327 : vector<1x128xf32> to vector<8x128xf32>
    %329 = arith.addf %325, %328 : vector<8x128xf32>
    %c0_127 = arith.constant 0 : index
    %c0_128 = arith.constant 0 : index
    %330 = vector.load %arg5[%c0_127, %c0_128] : memref<8x128xf32, #tpu.memory_space<vmem>>, vector<8x128xf32>
    tpu.vector_store %arg5[%c0_127, %c0_128], %329 {strides = array<i32>} : memref<8x128xf32, #tpu.memory_space<vmem>>, vector<8x128xf32>,
    return
  }
}

</mosaic_0001>

<bundles_post_ra>
// kernel: tpu_custom_call.1
= control target key start
LH: loop header
LB: loop body
LE: loop exit
PB: predicated region body
PF: predicated region fallthrough
CT: control target
= control target key end

     0   :  { %10 = vsyncpa [#allocation4], 0  ;;  %s2488_s0 = inlined_call_operand.vmem [shape: f32[80,16], index: 0, kind: input, shape index: {}]   ;;  %s2489_s1 = inlined_call_operand.hbm [shape: bf16[144,256], index: 1, kind: input, shape index: {}]   ;;  %s2490_s2 = inlined_call_operand.vmem [shape: f32[1,256], index: 2, kind: input, shape index: {}]   ;;  %s2491_s3 = inlined_call_operand.hbm [shape: bf16[4,128,128], index: 3, kind: input, shape index: {}]   ;;  %s2492_s4 = inlined_call_operand.vmem [shape: f32[4,1,128], index: 4, kind: input, shape index: {}]   ;;  %s2493_s5 = inlined_call_operand.hbm [shape: f32[8,128], index: 5, kind: output, shape index: {}]  }
   0x1   :  { %11 = vsyncpa [#allocation7], 0 }
   0x2   :  { %12 = vsyncpa [#allocation5], 0  ;;  %s1971_s18 = smov [#allocation3]   ;;  %s1899_s22 = scalar_lea.hbm %s2489_s1, 2304 }
   0x3   :  { %s20_s19 = sshll.u32 %s1971_s18, 4  ;;  %p1900_p0 = scmp.ne.s32.totalorder %s2489_s1, %s1899_s22  ;;  %s21_s19 = int_to_ptr.vmem [resolvable:$true] %s20_s19 }
   0x4   :  { %p1903_p1 = scmp.lt.u32.totalorder %s1899_s22, %s2489_s1 }
   0x6   :  { %p1905_p2 = pnand %p1903_p1, %p1900_p0 }
   0x8   :  { %1908 = shalt.err (!%p1905_p2)
}
   0x9   :  { %s1909_s27 = scalar_lea.vmem %s21_s19, 2304  ;;  %p1914_p4 = scmp.lt.s32.totalorder %s21_s19, %s21_s19 }
   0xa   :  { %p1910_p3 = scmp.ne.s32.totalorder %s21_s19, %s1909_s27  ;;  %p1915_p5 = scmp.lt.s32.totalorder %s1909_s27, %s1909_s27 }
   0xc   :  { %p1916_p6 = por %p1915_p5, %p1914_p4 }
   0xe   :  { %p1917_p7 = pnand %p1916_p6, %p1910_p3 }
  0x10   :  { %1920 = shalt.err (!%p1917_p7)
}
  0x11   :  { %s1972_s28 = smov 128   ;;  %s1973_s29 = smov 8  }
  0x12   :  { %26 = dma.hbm_to_vmem [thread:$0]  %s2489_s1, 2304, %s21_s19, [#allocation4], %s1972_s28, %s1972_s28, %s1973_s29  }
  0x13   :  { %s1974_s7 = smov [#allocation6]   ;;  %s1921_s11 = scalar_lea.hbm %s2491_s3, 4096 }
  0x14   :  { %s34_s8 = sshll.u32 %s1974_s7, 4  ;;  %p1922_p8 = scmp.ne.s32.totalorder %s2491_s3, %s1921_s11  ;;  %s35_s8 = int_to_ptr.vmem [resolvable:$true] %s34_s8 }
  0x15   :  { %p1925_p9 = scmp.lt.u32.totalorder %s1921_s11, %s2491_s3 }
  0x17   :  { %p1927_p10 = pnand %p1925_p9, %p1922_p8 }
  0x19   :  { %1930 = shalt.err (!%p1927_p10)
}
  0x1a   :  { %s1931_s16 = scalar_lea.vmem %s35_s8, 4096  ;;  %p1936_p12 = scmp.lt.s32.totalorder %s35_s8, %s35_s8 }
  0x1b   :  { %p1932_p11 = scmp.ne.s32.totalorder %s35_s8, %s1931_s16  ;;  %p1937_p13 = scmp.lt.s32.totalorder %s1931_s16, %s1931_s16 }
  0x1d   :  { %p1938_p0 = por %p1937_p13, %p1936_p12 }
  0x1f   :  { %p1939_p1 = pnand %p1938_p0, %p1932_p11 }
  0x21   :  { %1942 = shalt.err (!%p1939_p1)
}
  0x22   :  { %s1975_s1 = smov 64   ;;  %s1976_s17 = smov 4  }
  0x23   :  { %40 = dma.hbm_to_vmem [thread:$0]  %s2491_s3, 4096, %s35_s8, [#allocation7], %s1975_s1, %s1975_s1, %s1976_s17  }
  0x24   :  { %1965 = dma.done.wait [#allocation4], 2304  }
  0x25   :  { %1966 = vsyncadd [#allocation4], 4294964992 }
  0x26   :  { %1967 = dma.done.wait [#allocation7], 4096  }
  0x27   :  { %1968 = vsyncadd [#allocation7], 4294963200  ;;  %v1977_v0 = vmov 0   ;;  %v1710_v1 = vld [vmem:[#allocation3 + $0x4] ss:$8 sps:$4 sm:$0xff]   ;;  %vm89_vm0 = vcmask 130048   ;;  %v69_v33 = vlaneseq }
  0x28   :  { %177 = vmatprep.mubr.bf16.mxu1 %v1977_v0  ;;  %137 = vmatprep.mubr.bf16.mxu0 %v1977_v0  ;;  %v1712_v2 = vld [vmem:[#allocation3] ss:$8 sps:$4 sm:$0xff]   ;;  %v2045_v6 = vld [vmem:[#allocation3 + $0x14] ss:$8 sps:$4 sm:$0xff]   ;;  %v2047_v7 = vld [vmem:[#allocation3 + $0x10] ss:$8 sps:$4 sm:$0xff]  }
  0x29   :  { %v58_v3 = vld [vmem:[%s2488_s0 + $0x40] sm:$0xff]  ;;  %v59_v4 = vld [vmem:[%s2488_s0 + $0x48] sm:$0xff]  ;;  %1698 = vmatprep.subr.bf16.mxu1 %v1710_v1  ;;  %105 = vmatprep.subr.bf16.mxu0 %v1710_v1  ;;  %v2059_v10 = vld [vmem:[#allocation3 + $0x34] ss:$8 sps:$4 sm:$0xff]   ;;  %v70_v34 = vshrl.u32 %v69_v33, 7  ;;  %v2160_v54 = vand.u32 127, %v69_v33 }
  0x2a   :  { %v64_v5 = vpack.c.bf16 %v59_v4, %v58_v3  ;;  %1699 = vmatpush1.bf16.msra.mxu1 %v1712_v2  ;;  %106 = vmatpush1.bf16.msra.mxu0 %v1712_v2  ;;  %v2050_v8 = vld [vmem:[#allocation3 + $0x24] ss:$8 sps:$4 sm:$0xff]   ;;  %v2055_v9 = vld [vmem:[#allocation3 + $0x20] ss:$8 sps:$4 sm:$0xff]   ;;  %v2062_v11 = vld [vmem:[#allocation3 + $0x30] ss:$8 sps:$4 sm:$0xff]  }
  0x2b   :  { %309 = vmatprep.subr.bf16.mxu1 %v2045_v6  ;;  %381 = vmatprep.subr.bf16.mxu0 %v2045_v6  ;;  %v50_v12 = vld [vmem:[%s2488_s0] sm:$0xff]  ;;  %v51_v13 = vld [vmem:[%s2488_s0 + $0x8] sm:$0xff]  ;;  %v2075_v17 = vld [vmem:[#allocation3 + $0x54] ss:$8 sps:$4 sm:$0xff]   ;;  %v71_v35 = vsub.s32 0, %v70_v34  ;;  %v75_v37 = vsub.s32 1, %v70_v34 }
  0x2c   :  { %v2071_v14 = vld [vmem:[#allocation3 + $0x44] ss:$8 sps:$4 sm:$0xff]   ;;  %v60_v15 = vpack.c.bf16 %v51_v13, %v50_v12  ;;  %v2073_v16 = vld [vmem:[#allocation3 + $0x40] ss:$8 sps:$4 sm:$0xff]   ;;  %v2082_v18 = vld [vmem:[#allocation3 + $0x50] ss:$8 sps:$4 sm:$0xff]  }
  0x2d   :  { %1506 = vmatmul.mubr.msk.bf16.vlgmr.msra.gmra.mrb[0].mxu1 %vm89_vm0, %v64_v5  ;;  %v2085_v19 = vld [vmem:[#allocation3 + $0x64] ss:$8 sps:$4 sm:$0xff]   ;;  %v2091_v20 = vld [vmem:[#allocation3 + $0x60] ss:$8 sps:$4 sm:$0xff]   ;;  %v2093_v21 = vld [vmem:[#allocation3 + $0x74] ss:$8 sps:$4 sm:$0xff]  }
  0x2e   :  { %310 = vmatpush1.bf16.msra.mxu1 %v2047_v7  ;;  %341 = vmatprep.mubr.bf16.mxu1 %v1977_v0  ;;  %v2099_v22 = vld [vmem:[#allocation3 + $0x70] ss:$8 sps:$4 sm:$0xff]   ;;  %v2101_v23 = vld [vmem:[#allocation3 + $0x84] ss:$8 sps:$4 sm:$0xff]   ;;  %v2107_v24 = vld [vmem:[#allocation3 + $0x80] ss:$8 sps:$4 sm:$0xff]  }
  0x2f   :  { %311 = vmatprep.subr.bf16.mxu1 %v2050_v8  ;;  %1502 = vmatmul.mubr.msk.bf16.vlgmr.msra.gmra.mrb[0].mxu0 %vm89_vm0, %v60_v15  ;;  %v67_v36 = vld [vmem:[%s2490_s2] sm:$0x3]  ;;  %vm210_vm1 = vcmp.lt.s32.totalorder %v2160_v54, 64  ;;  %v52_v59 = vld [vmem:[%s2488_s0 + $0x10] sm:$0xff]  ;;  %v53_v60 = vld [vmem:[%s2488_s0 + $0x18] sm:$0xff]  ;;  %vm1979_vm2 = vmmov 0  }
  0x30   :  { %382 = vmatpush1.bf16.msra.mxu0 %v2047_v7  ;;  %147 = vmatprep.mubr.bf16.mxu0 %v1977_v0  ;;  %v2154_v38 = vrot.slane %v67_v36, %v71_v35  ;;  %v2156_v39 = vrot.slane %v67_v36, %v75_v37  ;;  %v61_v61 = vpack.c.bf16 %v53_v60, %v52_v59  ;;  %v54_v62 = vld [vmem:[%s2488_s0 + $0x20] sm:$0xff]  ;;  %v55_v63 = vld [vmem:[%s2488_s0 + $0x28] sm:$0xff]  ;;  %v56_v2 = vld [vmem:[%s2488_s0 + $0x30] sm:$0xff]  ;;  %s1980_s21 = smov [#allocation8]  }
  0x31   :  { %383 = vmatprep.subr.bf16.mxu0 %v2050_v8  ;;  %v62_v1 = vpack.c.bf16 %v55_v63, %v54_v62  ;;  %v57_v3 = vld [vmem:[%s2488_s0 + $0x38] sm:$0xff]  ;;  %v1755_v54 = vld [vmem:[#allocation6 + $0x90] sm:$0xff]   ;;  %s1490_s22 = sshll.u32 %s1980_s21, 4  ;;  %s1491_s22 = int_to_ptr.vmem [resolvable:$true] %s1490_s22 }
  0x32   :  { %312 = vmatpush1.bf16.msra.mxu1 %v2055_v9  ;;  %v63_v4 = vpack.c.bf16 %v57_v3, %v56_v2  ;;  %s1943_s23 = scalar_lea.vmem %s1491_s22, 128  ;;  %p1948_p3 = scmp.lt.s32.totalorder %s1491_s22, %s1491_s22 }
  0x33   :  { %313 = vmatprep.subr.bf16.mxu1 %v2059_v10  ;;  %p1944_p2 = scmp.ne.s32.totalorder %s1491_s22, %s1943_s23  ;;  %p1949_p4 = scmp.lt.s32.totalorder %s1943_s23, %s1943_s23 }
  0x34   :  { %384 = vmatpush1.bf16.msra.mxu0 %v2055_v9 }
  0x35   :  { %385 = vmatprep.subr.bf16.mxu0 %v2059_v10  ;;  %p1950_p5 = por %p1949_p4, %p1948_p3 }
  0x36   :  { %314 = vmatpush1.bf16.msra.mxu1 %v2062_v11 }
  0x37   :  { %315 = vmatprep.subr.bf16.mxu1 %v2071_v14  ;;  %1503 = vmatmul.mubr.msk.bf16.gmra.mrb[4].mxu0 %vm89_vm0, %v61_v61  ;;  %p1951_p6 = pnand %p1950_p5, %p1944_p2 }
  0x38   :  { %386 = vmatpush1.bf16.msra.mxu0 %v2062_v11  ;;  %157 = vmatprep.mubr.bf16.mxu0 %v1977_v0 }
  0x39   :  { %387 = vmatprep.subr.bf16.mxu0 %v2071_v14 }
  0x3a   :  { %316 = vmatpush1.bf16.msra.mxu1 %v2073_v16 }
  0x3b   :  { %317 = vmatprep.subr.bf16.mxu1 %v2075_v17 }
  0x3c   :  { %388 = vmatpush1.bf16.msra.mxu0 %v2073_v16 }
  0x3d   :  { %389 = vmatprep.subr.bf16.mxu0 %v2075_v17 }
  0x3e   :  { %318 = vmatpush1.bf16.msra.mxu1 %v2082_v18 }
  0x3f   :  { %319 = vmatprep.subr.bf16.mxu1 %v2085_v19  ;;  %1504 = vmatmul.mubr.msk.bf16.gmra.mrb[8].mxu0 %vm89_vm0, %v62_v1 }
  0x40   :  { %390 = vmatpush1.bf16.msra.mxu0 %v2082_v18  ;;  %167 = vmatprep.mubr.bf16.mxu0 %v1977_v0 }
  0x41   :  { %391 = vmatprep.subr.bf16.mxu0 %v2085_v19 }
  0x42   :  { %320 = vmatpush1.bf16.msra.mxu1 %v2091_v20 }
  0x43   :  { %321 = vmatprep.subr.bf16.mxu1 %v2093_v21 }
  0x44   :  { %392 = vmatpush1.bf16.msra.mxu0 %v2091_v20 }
  0x45   :  { %393 = vmatprep.subr.bf16.mxu0 %v2093_v21 }
  0x46   :  { %322 = vmatpush1.bf16.msra.mxu1 %v2099_v22 }
  0x47   :  { %323 = vmatprep.subr.bf16.mxu1 %v2101_v23  ;;  %1505 = vmatmul.mubr.msk.bf16.gmra.mrb[12].mxu0 %vm89_vm0, %v63_v4 }
  0x48   :  { %394 = vmatpush1.bf16.msra.mxu0 %v2099_v22  ;;  %413 = vmatprep.mubr.bf16.mxu0 %v1977_v0 }
  0x49   :  { %395 = vmatprep.subr.bf16.mxu0 %v2101_v23 }
  0x4a   :  { %324 = vmatpush1.bf16.msra.mxu1 %v2107_v24 }
  0x4b   :  { %453 = vmatprep.subr.bf16.mxu1 %v2045_v6 }
  0x4c   :  { %396 = vmatpush1.bf16.msra.mxu0 %v2107_v24 }
  0x4d   :  { %342 = vmatmul.mubr.bf16.vlgmr.msra.gmra.mrb[4].mxu1 %v1977_v0  ;;  %525 = vmatprep.subr.bf16.mxu0 %v2045_v6 }
  0x4e   :  { %454 = vmatpush1.bf16.msra.mxu1 %v2047_v7  ;;  %485 = vmatprep.mubr.bf16.mxu1 %v1977_v0 }
  0x4f   :  { %455 = vmatprep.subr.bf16.mxu1 %v2050_v8 }
  0x52   :  { %456 = vmatpush1.bf16.msra.mxu1 %v2055_v9 }
  0x53   :  { %457 = vmatprep.subr.bf16.mxu1 %v2059_v10 }
  0x56   :  { %458 = vmatpush1.bf16.msra.mxu1 %v2062_v11 }
  0x57   :  { %459 = vmatprep.subr.bf16.mxu1 %v2071_v14 }
  0x5a   :  { %460 = vmatpush1.bf16.msra.mxu1 %v2073_v16 }
  0x5b   :  { %461 = vmatprep.subr.bf16.mxu1 %v2075_v17 }
  0x5e   :  { %462 = vmatpush1.bf16.msra.mxu1 %v2082_v18 }
  0x5f   :  { %463 = vmatprep.subr.bf16.mxu1 %v2085_v19 }
  0x62   :  { %464 = vmatpush1.bf16.msra.mxu1 %v2091_v20 }
  0x63   :  { %465 = vmatprep.subr.bf16.mxu1 %v2093_v21 }
  0x66   :  { %466 = vmatpush1.bf16.msra.mxu1 %v2099_v22 }
  0x67   :  { %467 = vmatprep.subr.bf16.mxu1 %v2101_v23 }
  0x6a   :  { %468 = vmatpush1.bf16.msra.mxu1 %v2107_v24 }
  0x6b   :  { %597 = vmatprep.subr.bf16.mxu1 %v2045_v6 }
 0x100   :  { %v2139_v25 = vpop.f32.mrb[0].mxu1 }
 0x101   :  { %v2141_v26 = vpop.f32.mrb[1].mxu1 }
 0x102   :  { %v2143_v27 = vpop.f32.mrb[2].mxu1  ;;  %v139_v29 = vpop.f32.mrb[0].mxu0 }
 0x103   :  { %v2145_v28 = vpop.f32.mrb[3].mxu1  ;;  %v141_v30 = vpop.f32.mrb[1].mxu0  ;;  %v140_v40 = vadd.f32 %v139_v29, %v2154_v38 }
 0x104   :  { %v2147_v31 = vpop.f32.mrb[2].mxu0  ;;  %v142_v41 = vadd.f32 %v141_v30, %v2156_v39 }
 0x105   :  { %v2149_v32 = vpop.f32.mrb[3].mxu0 }
 0x10a   :  { %v2192_v34 = vpop.f32.mrb[4].mxu0 }
 0x10b   :  { %v2194_v35 = vpop.f32.mrb[5].mxu0 }
 0x10c   :  { %v2196_v36 = vpop.f32.mrb[6].mxu0 }
 0x10d   :  { %v2198_v37 = vpop.f32.mrb[7].mxu0 }
 0x120   :  { %v343_v42 = vpop.f32.mrb[4].mxu1 }
 0x121   :  { %v350_v43 = vadd.f32 %v343_v42, %v140_v40  ;;  %v345_v44 = vpop.f32.mrb[5].mxu1  ;;  %v2200_v40 = vpop.f32.mrb[8].mxu0 }
 0x122   :  { %v351_v45 = vadd.f32 %v345_v44, %v142_v41  ;;  %v347_v46 = vpop.f32.mrb[6].mxu1  ;;  %v2202_v41 = vpop.f32.mrb[9].mxu0 }
 0x123   :  { %v1523_v47 = vmul.f32 -1.442695, %v350_v43  ;;  %v348_v48 = vpop.f32.mrb[7].mxu1  ;;  %v2204_v42 = vpop.f32.mrb[10].mxu0 }
 0x124   :  { %v1524_v49 = vmul.f32 -1.442695, %v351_v45  ;;  %v2206_v43 = vpop.f32.mrb[11].mxu0 }
 0x125   :  { %1769 = vpow2.f32 %v1523_v47  ;;  %v2208_v44 = vpop.f32.mrb[12].mxu0 }
 0x126   :  { %1771 = vpow2.f32 %v1524_v49 }
 0x12f   :  { %v1770_v50 = vpop.eup %1769 }
 0x130   :  { %v1772_v51 = vpop.eup %1771  ;;  %v355_v52 = vadd.f32 1.0, %v1770_v50 }
 0x131   :  { %v361_v53 = vadd.f32 1.0, %v1772_v51  ;;  %v144_v51 = vadd.f32 %v2147_v31, %v2154_v38 }
 0x132   :  { %1773 = vrcp.f32 %v355_v52  ;;  %v146_v52 = vadd.f32 %v2149_v32, %v2156_v39 }
 0x133   :  { %1775 = vrcp.f32 %v361_v53 }
 0x134   :  { %1777 = vtanh.f32 %v351_v45  ;;  %v2210_v45 = vpop.f32.mrb[13].mxu0 }
 0x135   :  { %v2212_v46 = vpop.f32.mrb[14].mxu0 }
 0x136   :  { %v2214_v47 = vpop.f32.mrb[15].mxu0 }
 0x13c   :  { %v1774_v55 = vpop.eup %1773 }
 0x13d   :  { %v1776_v56 = vpop.eup %1775  ;;  %366 = vrot.lane.b32.xlu0 %v1774_v55, %s1975_s1 }
 0x13e   :  { %v1778_v57 = vpop.eup %1777 }
 0x13f   :  { %v365_v58 = vsel %vm210_vm1, %v1776_v56, %v1778_v57 }
 0x141   :  { %368 = vrot.lane.b32.xlu0 %v365_v58, %s1975_s1 }
 0x1af   :  { %v367_v5 = vpop.permute.xlu0 %366 }
 0x1b0   :  { %v370_v13 = vmul.f32 0.0, %v367_v5 }
 0x1b3   :  { %v369_v12 = vpop.permute.xlu0 %368 }
 0x1b4   :  { %v371_v15 = vmul.f32 %v1774_v55, %v369_v12 }
 0x1b6   :  { %v372_v29 = vadd.f32 %v371_v15, %v370_v13 }
 0x1b8   :  { %1779 = vtanh.f32 %v372_v29 }
 0x1c2   :  { %v1780_v30 = vpop.eup %1779 }
 0x1c3   :  { %v374_v33 = vmul.f32 %v1780_v30, %v365_v58 }
 0x1c5   :  { %375 = vrot.lane.b32.xlu1 %v374_v33, %s1975_s1 }
 0x237   :  { %v376_v48 = vpop.permute.xlu1 %375 }
 0x238   :  { %v377_v49 = vsel %vm210_vm1, %v372_v29, %v376_v48 }
 0x239   :  { %v380_v50 = vpack.c.bf16 %v377_v49, %v377_v49 }
 0x23b   :  { %414 = vmatmul.mubr.bf16.vlgmr.msra.gmra.mrb[16].mxu0 %v380_v50 }
 0x23c   :  { %526 = vmatpush1.bf16.msra.mxu0 %v2047_v7  ;;  %557 = vmatprep.mubr.bf16.mxu0 %v1977_v0 }
 0x23d   :  { %527 = vmatprep.subr.bf16.mxu0 %v2050_v8 }
 0x240   :  { %528 = vmatpush1.bf16.msra.mxu0 %v2055_v9 }
 0x241   :  { %529 = vmatprep.subr.bf16.mxu0 %v2059_v10 }
 0x244   :  { %530 = vmatpush1.bf16.msra.mxu0 %v2062_v11 }
 0x245   :  { %531 = vmatprep.subr.bf16.mxu0 %v2071_v14 }
 0x248   :  { %532 = vmatpush1.bf16.msra.mxu0 %v2073_v16 }
 0x249   :  { %533 = vmatprep.subr.bf16.mxu0 %v2075_v17 }
 0x24c   :  { %534 = vmatpush1.bf16.msra.mxu0 %v2082_v18 }
 0x24d   :  { %535 = vmatprep.subr.bf16.mxu0 %v2085_v19 }
 0x250   :  { %536 = vmatpush1.bf16.msra.mxu0 %v2091_v20 }
 0x251   :  { %537 = vmatprep.subr.bf16.mxu0 %v2093_v21 }
 0x254   :  { %538 = vmatpush1.bf16.msra.mxu0 %v2099_v22 }
 0x255   :  { %539 = vmatprep.subr.bf16.mxu0 %v2101_v23 }
 0x258   :  { %540 = vmatpush1.bf16.msra.mxu0 %v2107_v24 }
 0x259   :  { %669 = vmatprep.subr.bf16.mxu0 %v2045_v6 }
 0x30e   :  { %v415_v53 = vpop.f32.mrb[16].mxu0 }
 0x30f   :  { %v422_v55 = vadd.f32 %v415_v53, %v144_v51  ;;  %v417_v56 = vpop.f32.mrb[17].mxu0 }
 0x310   :  { %v423_v57 = vadd.f32 %v417_v56, %v146_v52  ;;  %v419_v58 = vpop.f32.mrb[18].mxu0  ;;  %v152_v52 = vadd.f32 %v2194_v35, %v2156_v39 }
 0x311   :  { %v1525_v59 = vmul.f32 -1.442695, %v422_v55  ;;  %v420_v60 = vpop.f32.mrb[19].mxu0 }
 0x312   :  { %v1526_v61 = vmul.f32 -1.442695, %v423_v57 }
 0x313   :  { %1781 = vpow2.f32 %v1525_v59 }
 0x314   :  { %1783 = vpow2.f32 %v1526_v61 }
 0x315   :  { %1785 = vtanh.f32 %v423_v57 }
 0x31d   :  { %v1782_v62 = vpop.eup %1781 }
 0x31e   :  { %v1784_v63 = vpop.eup %1783  ;;  %v427_v1 = vadd.f32 1.0, %v1782_v62 }
 0x31f   :  { %v433_v2 = vadd.f32 1.0, %v1784_v63  ;;  %v1786_v31 = vpop.eup %1785 }
 0x320   :  { %1787 = vrcp.f32 %v427_v1 }
 0x321   :  { %1789 = vrcp.f32 %v433_v2 }
 0x32a   :  { %v1788_v3 = vpop.eup %1787 }
 0x32b   :  { %v1790_v32 = vpop.eup %1789  ;;  %438 = vrot.lane.b32.xlu1 %v1788_v3, %s1975_s1 }
 0x32c   :  { %v437_v4 = vsel %vm210_vm1, %v1790_v32, %v1786_v31 }
 0x32d   :  { %440 = vrot.lane.b32.xlu0 %v437_v4, %s1975_s1 }
 0x39d   :  { %v439_v5 = vpop.permute.xlu1 %438 }
 0x39e   :  { %v442_v13 = vmul.f32 %v439_v5, %v377_v49  ;;  %v150_v49 = vadd.f32 %v2192_v34, %v2154_v38 }
 0x39f   :  { %v441_v12 = vpop.permute.xlu0 %440 }
 0x3a0   :  { %v443_v15 = vmul.f32 %v1788_v3, %v441_v12 }
 0x3a2   :  { %v444_v29 = vadd.f32 %v443_v15, %v442_v13 }
 0x3a4   :  { %1791 = vtanh.f32 %v444_v29 }
 0x3ae   :  { %v1792_v30 = vpop.eup %1791 }
 0x3af   :  { %v446_v33 = vmul.f32 %v1792_v30, %v437_v4 }
 0x3b1   :  { %447 = vrot.lane.b32.xlu1 %v446_v33, %s1975_s1 }
 0x423   :  { %v448_v48 = vpop.permute.xlu1 %447 }
 0x424   :  { %v449_v50 = vsel %vm210_vm1, %v444_v29, %v448_v48 }
 0x425   :  { %v452_v51 = vpack.c.bf16 %v449_v50, %v449_v50 }
 0x427   :  { %486 = vmatmul.mubr.bf16.vlgmr.msra.gmra.mrb[8].mxu1 %v452_v51  ;;  %v156_v51 = vadd.f32 %v2198_v37, %v2156_v39 }
 0x428   :  { %598 = vmatpush1.bf16.msra.mxu1 %v2047_v7  ;;  %629 = vmatprep.mubr.bf16.mxu1 %v1977_v0 }
 0x429   :  { %599 = vmatprep.subr.bf16.mxu1 %v2050_v8 }
 0x42c   :  { %600 = vmatpush1.bf16.msra.mxu1 %v2055_v9 }
 0x42d   :  { %601 = vmatprep.subr.bf16.mxu1 %v2059_v10 }
 0x430   :  { %602 = vmatpush1.bf16.msra.mxu1 %v2062_v11 }
 0x431   :  { %603 = vmatprep.subr.bf16.mxu1 %v2071_v14 }
 0x434   :  { %604 = vmatpush1.bf16.msra.mxu1 %v2073_v16 }
 0x435   :  { %605 = vmatprep.subr.bf16.mxu1 %v2075_v17 }
 0x438   :  { %606 = vmatpush1.bf16.msra.mxu1 %v2082_v18 }
 0x439   :  { %607 = vmatprep.subr.bf16.mxu1 %v2085_v19 }
 0x43c   :  { %608 = vmatpush1.bf16.msra.mxu1 %v2091_v20 }
 0x43d   :  { %609 = vmatprep.subr.bf16.mxu1 %v2093_v21 }
 0x440   :  { %610 = vmatpush1.bf16.msra.mxu1 %v2099_v22 }
 0x441   :  { %611 = vmatprep.subr.bf16.mxu1 %v2101_v23 }
 0x444   :  { %612 = vmatpush1.bf16.msra.mxu1 %v2107_v24 }
 0x445   :  { %741 = vmatprep.subr.bf16.mxu1 %v2045_v6 }
 0x4fa   :  { %v487_v53 = vpop.f32.mrb[8].mxu1 }
 0x4fb   :  { %v494_v55 = vadd.f32 %v487_v53, %v150_v49  ;;  %v489_v56 = vpop.f32.mrb[9].mxu1 }
 0x4fc   :  { %v495_v57 = vadd.f32 %v489_v56, %v152_v52  ;;  %v491_v58 = vpop.f32.mrb[10].mxu1 }
 0x4fd   :  { %v1527_v59 = vmul.f32 -1.442695, %v494_v55  ;;  %v492_v60 = vpop.f32.mrb[11].mxu1 }
 0x4fe   :  { %v1528_v61 = vmul.f32 -1.442695, %v495_v57 }
 0x4ff   :  { %1793 = vpow2.f32 %v1527_v59 }
 0x500   :  { %1795 = vpow2.f32 %v1528_v61 }
 0x501   :  { %1797 = vtanh.f32 %v495_v57 }
 0x509   :  { %v1794_v62 = vpop.eup %1793 }
 0x50a   :  { %v1796_v63 = vpop.eup %1795  ;;  %v499_v1 = vadd.f32 1.0, %v1794_v62 }
 0x50b   :  { %v505_v2 = vadd.f32 1.0, %v1796_v63  ;;  %v1798_v34 = vpop.eup %1797 }
 0x50c   :  { %1799 = vrcp.f32 %v499_v1 }
 0x50d   :  { %1801 = vrcp.f32 %v505_v2 }
 0x516   :  { %v1800_v31 = vpop.eup %1799 }
 0x517   :  { %v1802_v35 = vpop.eup %1801  ;;  %510 = vrot.lane.b32.xlu0 %v1800_v31, %s1975_s1 }
 0x518   :  { %v509_v3 = vsel %vm210_vm1, %v1802_v35, %v1798_v34 }
 0x519   :  { %512 = vrot.lane.b32.xlu1 %v509_v3, %s1975_s1 }
 0x589   :  { %v511_v32 = vpop.permute.xlu0 %510 }
 0x58a   :  { %v514_v5 = vmul.f32 %v511_v32, %v449_v50  ;;  %v154_v50 = vadd.f32 %v2196_v36, %v2154_v38 }
 0x58b   :  { %v513_v4 = vpop.permute.xlu1 %512 }
 0x58c   :  { %v515_v12 = vmul.f32 %v1800_v31, %v513_v4 }
 0x58e   :  { %v516_v13 = vadd.f32 %v515_v12, %v514_v5 }
 0x590   :  { %1803 = vtanh.f32 %v516_v13 }
 0x59a   :  { %v1804_v15 = vpop.eup %1803 }
 0x59b   :  { %v518_v29 = vmul.f32 %v1804_v15, %v509_v3 }
 0x59d   :  { %519 = vrot.lane.b32.xlu0 %v518_v29, %s1975_s1  ;;  %v160_v29 = vadd.f32 %v2200_v40, %v2154_v38 }
 0x60f   :  { %v520_v30 = vpop.permute.xlu0 %519 }
 0x610   :  { %v521_v33 = vsel %vm210_vm1, %v516_v13, %v520_v30  ;;  %v162_v30 = vadd.f32 %v2202_v41, %v2156_v39 }
 0x611   :  { %v524_v48 = vpack.c.bf16 %v521_v33, %v521_v33 }
 0x613   :  { %558 = vmatmul.mubr.bf16.vlgmr.msra.gmra.mrb[20].mxu0 %v524_v48 }
 0x614   :  { %670 = vmatpush1.bf16.msra.mxu0 %v2047_v7  ;;  %701 = vmatprep.mubr.bf16.mxu0 %v1977_v0 }
 0x615   :  { %671 = vmatprep.subr.bf16.mxu0 %v2050_v8 }
 0x618   :  { %672 = vmatpush1.bf16.msra.mxu0 %v2055_v9 }
 0x619   :  { %673 = vmatprep.subr.bf16.mxu0 %v2059_v10 }
 0x61c   :  { %674 = vmatpush1.bf16.msra.mxu0 %v2062_v11 }
 0x61d   :  { %675 = vmatprep.subr.bf16.mxu0 %v2071_v14 }
 0x620   :  { %676 = vmatpush1.bf16.msra.mxu0 %v2073_v16 }
 0x621   :  { %677 = vmatprep.subr.bf16.mxu0 %v2075_v17 }
 0x624   :  { %678 = vmatpush1.bf16.msra.mxu0 %v2082_v18 }
 0x625   :  { %679 = vmatprep.subr.bf16.mxu0 %v2085_v19 }
 0x628   :  { %680 = vmatpush1.bf16.msra.mxu0 %v2091_v20 }
 0x629   :  { %681 = vmatprep.subr.bf16.mxu0 %v2093_v21 }
 0x62c   :  { %682 = vmatpush1.bf16.msra.mxu0 %v2099_v22 }
 0x62d   :  { %683 = vmatprep.subr.bf16.mxu0 %v2101_v23 }
 0x630   :  { %684 = vmatpush1.bf16.msra.mxu0 %v2107_v24 }
 0x631   :  { %813 = vmatprep.subr.bf16.mxu0 %v2045_v6 }
 0x6e6   :  { %v559_v49 = vpop.f32.mrb[20].mxu0 }
 0x6e7   :  { %v566_v52 = vadd.f32 %v559_v49, %v154_v50  ;;  %v561_v53 = vpop.f32.mrb[21].mxu0 }
 0x6e8   :  { %v567_v55 = vadd.f32 %v561_v53, %v156_v51  ;;  %v563_v56 = vpop.f32.mrb[22].mxu0 }
 0x6e9   :  { %v1529_v57 = vmul.f32 -1.442695, %v566_v52  ;;  %v564_v58 = vpop.f32.mrb[23].mxu0 }
 0x6ea   :  { %v1530_v59 = vmul.f32 -1.442695, %v567_v55 }
 0x6eb   :  { %1805 = vpow2.f32 %v1529_v57 }
 0x6ec   :  { %1807 = vpow2.f32 %v1530_v59 }
 0x6ed   :  { %1809 = vtanh.f32 %v567_v55 }
 0x6f5   :  { %v1806_v60 = vpop.eup %1805 }
 0x6f6   :  { %v1808_v61 = vpop.eup %1807  ;;  %v571_v62 = vadd.f32 1.0, %v1806_v60 }
 0x6f7   :  { %v577_v63 = vadd.f32 1.0, %v1808_v61  ;;  %v1810_v36 = vpop.eup %1809 }
 0x6f8   :  { %1811 = vrcp.f32 %v571_v62 }
 0x6f9   :  { %1813 = vrcp.f32 %v577_v63 }
 0x702   :  { %v1812_v1 = vpop.eup %1811 }
 0x703   :  { %v1814_v37 = vpop.eup %1813  ;;  %582 = vrot.lane.b32.xlu1 %v1812_v1, %s1975_s1 }
 0x704   :  { %v581_v2 = vsel %vm210_vm1, %v1814_v37, %v1810_v36 }
 0x705   :  { %584 = vrot.lane.b32.xlu0 %v581_v2, %s1975_s1 }
 0x775   :  { %v583_v34 = vpop.permute.xlu1 %582 }
 0x776   :  { %v586_v35 = vmul.f32 %v583_v34, %v521_v33 }
 0x777   :  { %v585_v31 = vpop.permute.xlu0 %584 }
 0x778   :  { %v587_v3 = vmul.f32 %v1812_v1, %v585_v31 }
 0x77a   :  { %v588_v32 = vadd.f32 %v587_v3, %v586_v35 }
 0x77c   :  { %1815 = vtanh.f32 %v588_v32 }
 0x786   :  { %v1816_v4 = vpop.eup %1815 }
 0x787   :  { %v590_v5 = vmul.f32 %v1816_v4, %v581_v2  ;;  %v166_v4 = vadd.f32 %v2206_v43, %v2156_v39 }
 0x789   :  { %591 = vrot.lane.b32.xlu1 %v590_v5, %s1975_s1 }
 0x7fb   :  { %v592_v12 = vpop.permute.xlu1 %591 }
 0x7fc   :  { %v593_v13 = vsel %vm210_vm1, %v588_v32, %v592_v12  ;;  %v164_v32 = vadd.f32 %v2204_v42, %v2154_v38 }
 0x7fd   :  { %v596_v15 = vpack.c.bf16 %v593_v13, %v593_v13 }
 0x7ff   :  { %630 = vmatmul.mubr.bf16.vlgmr.msra.gmra.mrb[12].mxu1 %v596_v15 }
 0x800   :  { %742 = vmatpush1.bf16.msra.mxu1 %v2047_v7  ;;  %773 = vmatprep.mubr.bf16.mxu1 %v1977_v0 }
 0x801   :  { %743 = vmatprep.subr.bf16.mxu1 %v2050_v8 }
 0x804   :  { %744 = vmatpush1.bf16.msra.mxu1 %v2055_v9 }
 0x805   :  { %745 = vmatprep.subr.bf16.mxu1 %v2059_v10 }
 0x808   :  { %746 = vmatpush1.bf16.msra.mxu1 %v2062_v11 }
 0x809   :  { %747 = vmatprep.subr.bf16.mxu1 %v2071_v14 }
 0x80c   :  { %748 = vmatpush1.bf16.msra.mxu1 %v2073_v16 }
 0x80d   :  { %749 = vmatprep.subr.bf16.mxu1 %v2075_v17 }
 0x810   :  { %750 = vmatpush1.bf16.msra.mxu1 %v2082_v18 }
 0x811   :  { %751 = vmatprep.subr.bf16.mxu1 %v2085_v19 }
 0x814   :  { %752 = vmatpush1.bf16.msra.mxu1 %v2091_v20 }
 0x815   :  { %753 = vmatprep.subr.bf16.mxu1 %v2093_v21 }
 0x818   :  { %754 = vmatpush1.bf16.msra.mxu1 %v2099_v22 }
 0x819   :  { %755 = vmatprep.subr.bf16.mxu1 %v2101_v23 }
 0x81c   :  { %756 = vmatpush1.bf16.msra.mxu1 %v2107_v24 }
 0x81d   :  { %885 = vmatprep.subr.bf16.mxu1 %v2045_v6 }
 0x8d2   :  { %v631_v33 = vpop.f32.mrb[12].mxu1 }
 0x8d3   :  { %v638_v48 = vadd.f32 %v631_v33, %v160_v29  ;;  %v633_v50 = vpop.f32.mrb[13].mxu1 }
 0x8d4   :  { %v639_v51 = vadd.f32 %v633_v50, %v162_v30  ;;  %v635_v49 = vpop.f32.mrb[14].mxu1 }
 0x8d5   :  { %v1531_v52 = vmul.f32 -1.442695, %v638_v48  ;;  %v636_v53 = vpop.f32.mrb[15].mxu1 }
 0x8d6   :  { %v1532_v55 = vmul.f32 -1.442695, %v639_v51 }
 0x8d7   :  { %1817 = vpow2.f32 %v1531_v52 }
 0x8d8   :  { %1819 = vpow2.f32 %v1532_v55 }
 0x8d9   :  { %1821 = vtanh.f32 %v639_v51 }
 0x8e1   :  { %v1818_v56 = vpop.eup %1817 }
 0x8e2   :  { %v1820_v57 = vpop.eup %1819  ;;  %v643_v58 = vadd.f32 1.0, %v1818_v56 }
 0x8e3   :  { %v649_v59 = vadd.f32 1.0, %v1820_v57  ;;  %v1822_v40 = vpop.eup %1821 }
 0x8e4   :  { %1823 = vrcp.f32 %v643_v58 }
 0x8e5   :  { %1825 = vrcp.f32 %v649_v59 }
 0x8ee   :  { %v1824_v60 = vpop.eup %1823 }
 0x8ef   :  { %v1826_v41 = vpop.eup %1825  ;;  %654 = vrot.lane.b32.xlu0 %v1824_v60, %s1975_s1 }
 0x8f0   :  { %v653_v61 = vsel %vm210_vm1, %v1826_v41, %v1822_v40 }
 0x8f1   :  { %656 = vrot.lane.b32.xlu1 %v653_v61, %s1975_s1 }
 0x961   :  { %v655_v62 = vpop.permute.xlu0 %654 }
 0x962   :  { %v658_v36 = vmul.f32 %v655_v62, %v593_v13 }
 0x963   :  { %v657_v63 = vpop.permute.xlu1 %656 }
 0x964   :  { %v659_v1 = vmul.f32 %v1824_v60, %v657_v63 }
 0x966   :  { %v660_v37 = vadd.f32 %v659_v1, %v658_v36 }
 0x968   :  { %1827 = vtanh.f32 %v660_v37 }
 0x972   :  { %v1828_v2 = vpop.eup %1827 }
 0x973   :  { %v662_v34 = vmul.f32 %v1828_v2, %v653_v61 }
 0x975   :  { %663 = vrot.lane.b32.xlu0 %v662_v34, %s1975_s1 }
 0x9e7   :  { %v664_v31 = vpop.permute.xlu0 %663 }
 0x9e8   :  { %v665_v35 = vsel %vm210_vm1, %v660_v37, %v664_v31 }
 0x9e9   :  { %v668_v3 = vpack.c.bf16 %v665_v35, %v665_v35 }
 0x9eb   :  { %702 = vmatmul.mubr.bf16.vlgmr.msra.gmra.mrb[24].mxu0 %v668_v3 }
 0x9ec   :  { %814 = vmatpush1.bf16.msra.mxu0 %v2047_v7  ;;  %845 = vmatprep.mubr.bf16.mxu0 %v1977_v0 }
 0x9ed   :  { %815 = vmatprep.subr.bf16.mxu0 %v2050_v8 }
 0x9f0   :  { %816 = vmatpush1.bf16.msra.mxu0 %v2055_v9 }
 0x9f1   :  { %817 = vmatprep.subr.bf16.mxu0 %v2059_v10 }
 0x9f4   :  { %818 = vmatpush1.bf16.msra.mxu0 %v2062_v11 }
 0x9f5   :  { %819 = vmatprep.subr.bf16.mxu0 %v2071_v14 }
 0x9f8   :  { %820 = vmatpush1.bf16.msra.mxu0 %v2073_v16 }
 0x9f9   :  { %821 = vmatprep.subr.bf16.mxu0 %v2075_v17 }
 0x9fc   :  { %822 = vmatpush1.bf16.msra.mxu0 %v2082_v18 }
 0x9fd   :  { %823 = vmatprep.subr.bf16.mxu0 %v2085_v19 }
 0xa00   :  { %824 = vmatpush1.bf16.msra.mxu0 %v2091_v20 }
 0xa01   :  { %825 = vmatprep.subr.bf16.mxu0 %v2093_v21 }
 0xa04   :  { %826 = vmatpush1.bf16.msra.mxu0 %v2099_v22 }
 0xa05   :  { %827 = vmatprep.subr.bf16.mxu0 %v2101_v23 }
 0xa08   :  { %828 = vmatpush1.bf16.msra.mxu0 %v2107_v24 }
 0xa09   :  { %957 = vmatprep.subr.bf16.mxu0 %v2045_v6 }
 0xabe   :  { %v703_v5 = vpop.f32.mrb[24].mxu0 }
 0xabf   :  { %v710_v12 = vadd.f32 %v703_v5, %v164_v32  ;;  %v705_v13 = vpop.f32.mrb[25].mxu0 }
 0xac0   :  { %v711_v15 = vadd.f32 %v705_v13, %v166_v4  ;;  %v707_v29 = vpop.f32.mrb[26].mxu0 }
 0xac1   :  { %v1533_v30 = vmul.f32 -1.442695, %v710_v12  ;;  %v708_v33 = vpop.f32.mrb[27].mxu0 }
 0xac2   :  { %v1534_v48 = vmul.f32 -1.442695, %v711_v15  ;;  %v1890_v33 = vld [vmem:[#allocation3 + $0x24] ss:$8 sps:$4 sm:$0xff]  }
 0xac3   :  { %1829 = vpow2.f32 %v1533_v30  ;;  %v1889_v30 = vld [vmem:[#allocation3 + $0x10] ss:$8 sps:$4 sm:$0xff]  }
 0xac4   :  { %1831 = vpow2.f32 %v1534_v48  ;;  %v1891_v48 = vld [vmem:[#allocation3 + $0x20] ss:$8 sps:$4 sm:$0xff]  }
 0xac5   :  { %1833 = vtanh.f32 %v711_v15 }
 0xacd   :  { %v1830_v50 = vpop.eup %1829 }
 0xace   :  { %v1832_v51 = vpop.eup %1831  ;;  %v715_v49 = vadd.f32 1.0, %v1830_v50  ;;  %v1892_v50 = vld [vmem:[#allocation3 + $0x34] ss:$8 sps:$4 sm:$0xff]  }
 0xacf   :  { %v721_v6 = vadd.f32 1.0, %v1832_v51  ;;  %v1834_v42 = vpop.eup %1833  ;;  %v1893_v51 = vld [vmem:[#allocation3 + $0x30] ss:$8 sps:$4 sm:$0xff]  }
 0xad0   :  { %1835 = vrcp.f32 %v715_v49  ;;  %v1894_v49 = vld [vmem:[#allocation3 + $0x44] ss:$8 sps:$4 sm:$0xff]  }
 0xad1   :  { %1837 = vrcp.f32 %v721_v6  ;;  %v1895_v6 = vld [vmem:[#allocation3 + $0x40] ss:$8 sps:$4 sm:$0xff]  }
 0xada   :  { %v1836_v52 = vpop.eup %1835 }
 0xadb   :  { %v1838_v43 = vpop.eup %1837  ;;  %726 = vrot.lane.b32.xlu1 %v1836_v52, %s1975_s1 }
 0xadc   :  { %v725_v53 = vsel %vm210_vm1, %v1838_v43, %v1834_v42  ;;  %v1896_v42 = vld [vmem:[#allocation3 + $0x54] ss:$8 sps:$4 sm:$0xff]   ;;  %v1898_v43 = vld [vmem:[#allocation3 + $0x64] ss:$8 sps:$4 sm:$0xff]  }
 0xadd   :  { %728 = vrot.lane.b32.xlu0 %v725_v53, %s1975_s1 }
 0xb4d   :  { %v727_v55 = vpop.permute.xlu1 %726 }
 0xb4e   :  { %v730_v57 = vmul.f32 %v727_v55, %v665_v35 }
 0xb4f   :  { %v729_v56 = vpop.permute.xlu0 %728 }
 0xb50   :  { %v731_v58 = vmul.f32 %v1836_v52, %v729_v56  ;;  %v1897_v52 = vld [vmem:[#allocation3 + $0x50] ss:$8 sps:$4 sm:$0xff]  }
 0xb52   :  { %v732_v59 = vadd.f32 %v731_v58, %v730_v57 }
 0xb54   :  { %1839 = vtanh.f32 %v732_v59 }
 0xb5e   :  { %v1840_v40 = vpop.eup %1839 }
 0xb5f   :  { %v734_v60 = vmul.f32 %v1840_v40, %v725_v53  ;;  %v176_v53 = vadd.f32 %v2214_v47, %v2156_v39 }
 0xb61   :  { %735 = vrot.lane.b32.xlu1 %v734_v60, %s1975_s1 }
 0xbd3   :  { %v736_v41 = vpop.permute.xlu1 %735 }
 0xbd4   :  { %v737_v61 = vsel %vm210_vm1, %v732_v59, %v736_v41 }
 0xbd5   :  { %v740_v62 = vpack.c.bf16 %v737_v61, %v737_v61 }
 0xbd7   :  { %774 = vmatmul.mubr.bf16.vlgmr.msra.gmra.mrb[16].mxu1 %v740_v62 }
 0xbd8   :  { %886 = vmatpush1.bf16.msra.mxu1 %v2047_v7  ;;  %917 = vmatprep.mubr.bf16.mxu1 %v1977_v0  ;;  %v170_v7 = vadd.f32 %v2208_v44, %v2154_v38 }
 0xbd9   :  { %887 = vmatprep.subr.bf16.mxu1 %v2050_v8  ;;  %v172_v8 = vadd.f32 %v2210_v45, %v2156_v39 }
 0xbdc   :  { %888 = vmatpush1.bf16.msra.mxu1 %v2055_v9 }
 0xbdd   :  { %889 = vmatprep.subr.bf16.mxu1 %v2059_v10 }
 0xbe0   :  { %890 = vmatpush1.bf16.msra.mxu1 %v2062_v11 }
 0xbe1   :  { %891 = vmatprep.subr.bf16.mxu1 %v2071_v14 }
 0xbe4   :  { %892 = vmatpush1.bf16.msra.mxu1 %v2073_v16 }
 0xbe5   :  { %893 = vmatprep.subr.bf16.mxu1 %v2075_v17 }
 0xbe8   :  { %894 = vmatpush1.bf16.msra.mxu1 %v2082_v18 }
 0xbe9   :  { %895 = vmatprep.subr.bf16.mxu1 %v2085_v19 }
 0xbec   :  { %896 = vmatpush1.bf16.msra.mxu1 %v2091_v20 }
 0xbed   :  { %897 = vmatprep.subr.bf16.mxu1 %v2093_v21 }
 0xbf0   :  { %898 = vmatpush1.bf16.msra.mxu1 %v2099_v22 }
 0xbf1   :  { %899 = vmatprep.subr.bf16.mxu1 %v2101_v23 }
 0xbf4   :  { %900 = vmatpush1.bf16.msra.mxu1 %v2107_v24 }
 0xcaa   :  { %v775_v9 = vpop.f32.mrb[16].mxu1 }
 0xcab   :  { %v782_v10 = vadd.f32 %v775_v9, %v170_v7  ;;  %v777_v11 = vpop.f32.mrb[17].mxu1 }
 0xcac   :  { %v783_v14 = vadd.f32 %v777_v11, %v172_v8  ;;  %v779_v16 = vpop.f32.mrb[18].mxu1 }
 0xcad   :  { %v1535_v17 = vmul.f32 -1.442695, %v782_v10  ;;  %v780_v18 = vpop.f32.mrb[19].mxu1 }
 0xcae   :  { %v1536_v19 = vmul.f32 -1.442695, %v783_v14 }
 0xcaf   :  { %1841 = vpow2.f32 %v1535_v17 }
 0xcb0   :  { %1843 = vpow2.f32 %v1536_v19  ;;  %v180_v19 = vadd.f32 %v2139_v25, %v2154_v38 }
 0xcb1   :  { %1845 = vtanh.f32 %v783_v14 }
 0xcb9   :  { %v1842_v63 = vpop.eup %1841 }
 0xcba   :  { %v1844_v36 = vpop.eup %1843  ;;  %v787_v1 = vadd.f32 1.0, %v1842_v63  ;;  %v182_v63 = vadd.f32 %v2141_v26, %v2156_v39 }
 0xcbb   :  { %v793_v37 = vadd.f32 1.0, %v1844_v36  ;;  %v1846_v44 = vpop.eup %1845 }
 0xcbc   :  { %1847 = vrcp.f32 %v787_v1 }
 0xcbd   :  { %1849 = vrcp.f32 %v793_v37 }
 0xcc6   :  { %v1848_v2 = vpop.eup %1847 }
 0xcc7   :  { %v1850_v45 = vpop.eup %1849  ;;  %798 = vrot.lane.b32.xlu0 %v1848_v2, %s1975_s1 }
 0xcc8   :  { %v797_v34 = vsel %vm210_vm1, %v1850_v45, %v1846_v44 }
 0xcc9   :  { %800 = vrot.lane.b32.xlu1 %v797_v34, %s1975_s1 }
 0xd39   :  { %v799_v31 = vpop.permute.xlu0 %798 }
 0xd3a   :  { %v802_v3 = vmul.f32 %v799_v31, %v737_v61 }
 0xd3b   :  { %v801_v35 = vpop.permute.xlu1 %800 }
 0xd3c   :  { %v803_v32 = vmul.f32 %v1848_v2, %v801_v35 }
 0xd3e   :  { %v804_v4 = vadd.f32 %v803_v32, %v802_v3 }
 0xd40   :  { %1851 = vtanh.f32 %v804_v4 }
 0xd4a   :  { %v1852_v5 = vpop.eup %1851 }
 0xd4b   :  { %v806_v12 = vmul.f32 %v1852_v5, %v797_v34 }
 0xd4d   :  { %807 = vrot.lane.b32.xlu0 %v806_v12, %s1975_s1 }
 0xdbf   :  { %v808_v13 = vpop.permute.xlu0 %807 }
 0xdc0   :  { %v809_v15 = vsel %vm210_vm1, %v804_v4, %v808_v13 }
 0xdc1   :  { %v812_v29 = vpack.c.bf16 %v809_v15, %v809_v15 }
 0xdc3   :  { %846 = vmatmul.mubr.bf16.vlgmr.msra.gmra.mrb[28].mxu0 %v812_v29 }
 0xdc4   :  { %958 = vmatpush1.bf16.msra.mxu0 %v1889_v30  ;;  %989 = vmatprep.mubr.bf16.mxu0 %v1977_v0  ;;  %v174_v0 = vadd.f32 %v2212_v46, %v2154_v38 }
 0xdc5   :  { %959 = vmatprep.subr.bf16.mxu0 %v1890_v33 }
 0xdc8   :  { %960 = vmatpush1.bf16.msra.mxu0 %v1891_v48 }
 0xdc9   :  { %961 = vmatprep.subr.bf16.mxu0 %v1892_v50 }
 0xdcc   :  { %962 = vmatpush1.bf16.msra.mxu0 %v1893_v51 }
 0xdcd   :  { %963 = vmatprep.subr.bf16.mxu0 %v1894_v49 }
 0xdd0   :  { %964 = vmatpush1.bf16.msra.mxu0 %v1895_v6 }
 0xdd1   :  { %965 = vmatprep.subr.bf16.mxu0 %v1896_v42  ;;  %v184_v42 = vadd.f32 %v2143_v27, %v2154_v38 }
 0xdd4   :  { %966 = vmatpush1.bf16.msra.mxu0 %v1897_v52  ;;  %v186_v52 = vadd.f32 %v2145_v28, %v2156_v39 }
 0xdd5   :  { %967 = vmatprep.subr.bf16.mxu0 %v1898_v43 }
 0xdd8   :  { %968 = vmatpush1.bf16.msra.mxu0 %v2091_v20 }
 0xdd9   :  { %969 = vmatprep.subr.bf16.mxu0 %v2093_v21 }
 0xddc   :  { %970 = vmatpush1.bf16.msra.mxu0 %v2099_v22 }
 0xddd   :  { %971 = vmatprep.subr.bf16.mxu0 %v2101_v23 }
 0xde0   :  { %972 = vmatpush1.bf16.msra.mxu0 %v2107_v24 }
 0xe96   :  { %v847_v55 = vpop.f32.mrb[28].mxu0 }
 0xe97   :  { %v854_v56 = vadd.f32 %v847_v55, %v174_v0  ;;  %v849_v57 = vpop.f32.mrb[29].mxu0 }
 0xe98   :  { %v855_v58 = vadd.f32 %v849_v57, %v176_v53  ;;  %v851_v59 = vpop.f32.mrb[30].mxu0 }
 0xe99   :  { %v1537_v20 = vmul.f32 -1.442695, %v854_v56  ;;  %v852_v40 = vpop.f32.mrb[31].mxu0 }
 0xe9a   :  { %v1538_v21 = vmul.f32 -1.442695, %v855_v58 }
 0xe9b   :  { %1853 = vpow2.f32 %v1537_v20 }
 0xe9c   :  { %1855 = vpow2.f32 %v1538_v21 }
 0xe9d   :  { %1857 = vtanh.f32 %v855_v58 }
 0xea5   :  { %v1854_v22 = vpop.eup %1853 }
 0xea6   :  { %v1856_v23 = vpop.eup %1855  ;;  %v859_v60 = vadd.f32 1.0, %v1854_v22 }
 0xea7   :  { %v865_v24 = vadd.f32 1.0, %v1856_v23  ;;  %v1858_v46 = vpop.eup %1857  ;;  %v1737_v23 = vld [vmem:[#allocation6] sm:$0xff]  }
 0xea8   :  { %1859 = vrcp.f32 %v859_v60  ;;  %v1978_v60 = vmov 0.0  }
 0xea9   :  { %1861 = vrcp.f32 %v865_v24  ;;  %1618 = vmatprep.subr.bf16.mxu1 %v1978_v60  ;;  %1638 = vmatprep.subr.bf16.mxu0 %v1978_v60  ;;  %v1738_v24 = vld [vmem:[#allocation6 + $0x8] sm:$0xff]  }
 0xeb2   :  { %v1860_v41 = vpop.eup %1859 }
 0xeb3   :  { %v1862_v47 = vpop.eup %1861  ;;  %870 = vrot.lane.b32.xlu1 %v1860_v41, %s1975_s1 }
 0xeb4   :  { %v869_v61 = vsel %vm210_vm1, %v1862_v47, %v1858_v46  ;;  %v1739_v46 = vld [vmem:[#allocation6 + $0x10] sm:$0xff]   ;;  %v1741_v47 = vld [vmem:[#allocation6 + $0x20] sm:$0xff]  }
 0xeb5   :  { %872 = vrot.lane.b32.xlu0 %v869_v61, %s1975_s1 }
 0xf25   :  { %v871_v62 = vpop.permute.xlu1 %870 }
 0xf26   :  { %v874_v8 = vmul.f32 %v871_v62, %v809_v15  ;;  %v1743_v62 = vld [vmem:[#allocation6 + $0x30] sm:$0xff]  }
 0xf27   :  { %v873_v7 = vpop.permute.xlu0 %872 }
 0xf28   :  { %v875_v9 = vmul.f32 %v1860_v41, %v873_v7  ;;  %v1740_v41 = vld [vmem:[#allocation6 + $0x18] sm:$0xff]  }
 0xf2a   :  { %v876_v10 = vadd.f32 %v875_v9, %v874_v8 }
 0xf2c   :  { %1863 = vtanh.f32 %v876_v10 }
 0xf36   :  { %v1864_v11 = vpop.eup %1863 }
 0xf37   :  { %v878_v14 = vmul.f32 %v1864_v11, %v869_v61  ;;  %v1742_v61 = vld [vmem:[#allocation6 + $0x28] sm:$0xff]  }
 0xf39   :  { %879 = vrot.lane.b32.xlu1 %v878_v14, %s1975_s1  ;;  %v1744_v14 = vld [vmem:[#allocation6 + $0x38] sm:$0xff]  }
 0xfab   :  { %v880_v16 = vpop.permute.xlu1 %879 }
 0xfac   :  { %v881_v17 = vsel %vm210_vm1, %v876_v10, %v880_v16  ;;  %v1745_v16 = vld [vmem:[#allocation6 + $0x40] sm:$0xff]  }
 0xfad   :  { %v884_v18 = vpack.c.bf16 %v881_v17, %v881_v17 }
 0xfaf   :  { %918 = vmatmul.mubr.bf16.vlgmr.msra.gmra.mrb[20].mxu1 %v884_v18  ;;  %v1747_v18 = vld [vmem:[#allocation6 + $0x50] sm:$0xff]  }
 0xfb0   :  { %1619 = vmatpush3.bf16.msra.mxu1 %v1737_v23  ;;  %1634 = vmatprep.mubr.msk.bf16.mxu1 %vm1979_vm2, %v1978_v60 }
 0xfb1   :  { %1620 = vmatprep.subr.bf16.mxu1 %v1978_v60 }
 0xfb4   :  { %1621 = vmatpush3.bf16.msra.mxu1 %v1738_v24 }
 0xfb5   :  { %1622 = vmatprep.subr.bf16.mxu1 %v1978_v60 }
 0xfb8   :  { %1623 = vmatpush3.bf16.msra.mxu1 %v1739_v46 }
 0xfb9   :  { %1624 = vmatprep.subr.bf16.mxu1 %v1978_v60 }
 0xfbc   :  { %1625 = vmatpush3.bf16.msra.mxu1 %v1740_v41  ;;  %v1573_v41 = vld [vmem:[%s2492_s4 + $0x3] ss:$0 sm:$0xff] }
 0xfbd   :  { %1626 = vmatprep.subr.bf16.mxu1 %v1978_v60 }
 0xfc0   :  { %1627 = vmatpush3.bf16.msra.mxu1 %v1741_v47 }
 0xfc1   :  { %1628 = vmatprep.subr.bf16.mxu1 %v1978_v60 }
 0xfc4   :  { %1629 = vmatpush3.bf16.msra.mxu1 %v1742_v61 }
 0xfc5   :  { %1630 = vmatprep.subr.bf16.mxu1 %v1978_v60 }
 0xfc8   :  { %1631 = vmatpush3.bf16.msra.mxu1 %v1743_v62 }
 0xfc9   :  { %1632 = vmatprep.subr.bf16.mxu1 %v1978_v60 }
 0xfcc   :  { %1633 = vmatpush3.bf16.msra.mxu1 %v1744_v14 }
 0xfcd   :  { %1658 = vmatprep.subr.bf16.mxu1 %v1978_v60 }
0x1082   :  { %v919_v36 = vpop.f32.mrb[20].mxu1 }
0x1083   :  { %v926_v1 = vadd.f32 %v919_v36, %v180_v19  ;;  %v921_v37 = vpop.f32.mrb[21].mxu1  ;;  %v1748_v36 = vld [vmem:[#allocation6 + $0x58] sm:$0xff]  }
0x1084   :  { %v927_v44 = vadd.f32 %v921_v37, %v182_v63  ;;  %v923_v2 = vpop.f32.mrb[22].mxu1  ;;  %v1750_v37 = vld [vmem:[#allocation6 + $0x68] sm:$0xff]  }
0x1085   :  { %v1539_v45 = vmul.f32 -1.442695, %v926_v1  ;;  %v924_v34 = vpop.f32.mrb[23].mxu1  ;;  %v1749_v1 = vld [vmem:[#allocation6 + $0x60] sm:$0xff]  }
0x1086   :  { %v1540_v31 = vmul.f32 -1.442695, %v927_v44  ;;  %v1751_v34 = vld [vmem:[#allocation6 + $0x70] sm:$0xff]  }
0x1087   :  { %1865 = vpow2.f32 %v1539_v45 }
0x1088   :  { %1867 = vpow2.f32 %v1540_v31  ;;  %v1752_v31 = vld [vmem:[#allocation6 + $0x78] sm:$0xff]  }
0x1089   :  { %1869 = vtanh.f32 %v927_v44 }
0x1091   :  { %v1866_v35 = vpop.eup %1865 }
0x1092   :  { %v1868_v3 = vpop.eup %1867  ;;  %v931_v32 = vadd.f32 1.0, %v1866_v35  ;;  %v1753_v35 = vld [vmem:[#allocation6 + $0x80] sm:$0xff]  }
0x1093   :  { %v937_v4 = vadd.f32 1.0, %v1868_v3  ;;  %v1870_v25 = vpop.eup %1869  ;;  %v1754_v3 = vld [vmem:[#allocation6 + $0x88] sm:$0xff]  }
0x1094   :  { %1871 = vrcp.f32 %v931_v32  ;;  %v1756_v32 = vld [vmem:[#allocation6 + $0x98] sm:$0xff]  }
0x1095   :  { %1873 = vrcp.f32 %v937_v4  ;;  %v1757_v4 = vld [vmem:[#allocation6 + $0xa0] sm:$0xff]  }
0x109e   :  { %v1872_v5 = vpop.eup %1871 }
0x109f   :  { %v1874_v26 = vpop.eup %1873  ;;  %942 = vrot.lane.b32.xlu0 %v1872_v5, %s1975_s1 }
0x10a0   :  { %v941_v12 = vsel %vm210_vm1, %v1874_v26, %v1870_v25  ;;  %v1758_v25 = vld [vmem:[#allocation6 + $0xa8] sm:$0xff]  }
0x10a1   :  { %944 = vrot.lane.b32.xlu1 %v941_v12, %s1975_s1 }
0x1111   :  { %v943_v13 = vpop.permute.xlu0 %942 }
0x1112   :  { %v946_v29 = vmul.f32 %v943_v13, %v881_v17  ;;  %v1746_v17 = vld [vmem:[#allocation6 + $0x48] sm:$0xff]  }
0x1113   :  { %v945_v15 = vpop.permute.xlu1 %944 }
0x1114   :  { %v947_v30 = vmul.f32 %v1872_v5, %v945_v15  ;;  %v1543_v5 = vld [vmem:[%s2492_s4] ss:$0 sm:$0xff] }
0x1116   :  { %v948_v33 = vadd.f32 %v947_v30, %v946_v29 }
0x1118   :  { %1875 = vtanh.f32 %v948_v33 }
0x1122   :  { %v1876_v48 = vpop.eup %1875 }
0x1123   :  { %v950_v50 = vmul.f32 %v1876_v48, %v941_v12  ;;  %v1759_v48 = vld [vmem:[#allocation6 + $0xb0] sm:$0xff]  }
0x1125   :  { %951 = vrot.lane.b32.xlu0 %v950_v50, %s1975_s1  ;;  %v1760_v50 = vld [vmem:[#allocation6 + $0xb8] sm:$0xff]  }
0x1197   :  { %v952_v51 = vpop.permute.xlu0 %951 }
0x1198   :  { %v953_v49 = vsel %vm210_vm1, %v948_v33, %v952_v51  ;;  %v1761_v51 = vld [vmem:[#allocation6 + $0xc0] sm:$0xff]  }
0x1199   :  { %v956_v6 = vpack.c.bf16 %v953_v49, %v953_v49 }
0x119b   :  { %990 = vmatmul.mubr.bf16.vlgmr.msra.gmra.mrb[32].mxu0 %v956_v6  ;;  %v1763_v6 = vld [vmem:[#allocation6 + $0xd0] sm:$0xff]  }
0x119c   :  { %1654 = vmatprep.mubr.msk.bf16.mxu0 %vm1979_vm2, %v1978_v60  ;;  %1639 = vmatpush3.bf16.msra.mxu0 %v1745_v16 }
0x119d   :  { %1640 = vmatprep.subr.bf16.mxu0 %v1978_v60 }
0x11a0   :  { %1641 = vmatpush3.bf16.msra.mxu0 %v1746_v17 }
0x11a1   :  { %1642 = vmatprep.subr.bf16.mxu0 %v1978_v60 }
0x11a4   :  { %1643 = vmatpush3.bf16.msra.mxu0 %v1747_v18 }
0x11a5   :  { %1644 = vmatprep.subr.bf16.mxu0 %v1978_v60 }
0x11a8   :  { %1645 = vmatpush3.bf16.msra.mxu0 %v1748_v36 }
0x11a9   :  { %1646 = vmatprep.subr.bf16.mxu0 %v1978_v60 }
0x11ac   :  { %1647 = vmatpush3.bf16.msra.mxu0 %v1749_v1 }
0x11ad   :  { %1648 = vmatprep.subr.bf16.mxu0 %v1978_v60 }
0x11b0   :  { %1649 = vmatpush3.bf16.msra.mxu0 %v1750_v37 }
0x11b1   :  { %1650 = vmatprep.subr.bf16.mxu0 %v1978_v60 }
0x11b4   :  { %1651 = vmatpush3.bf16.msra.mxu0 %v1751_v34 }
0x11b5   :  { %1652 = vmatprep.subr.bf16.mxu0 %v1978_v60 }
0x11b8   :  { %1653 = vmatpush3.bf16.msra.mxu0 %v1752_v31 }
0x11b9   :  { %1678 = vmatprep.subr.bf16.mxu0 %v1978_v60 }
0x126e   :  { %v991_v43 = vpop.f32.mrb[32].mxu0 }
0x126f   :  { %v998_v0 = vadd.f32 %v991_v43, %v184_v42  ;;  %v993_v53 = vpop.f32.mrb[33].mxu0  ;;  %v1764_v42 = vld [vmem:[#allocation6 + $0xd8] sm:$0xff]   ;;  %v1766_v43 = vld [vmem:[#allocation6 + $0xe8] sm:$0xff]  }
0x1270   :  { %v999_v55 = vadd.f32 %v993_v53, %v186_v52  ;;  %v995_v56 = vpop.f32.mrb[34].mxu0  ;;  %v1765_v52 = vld [vmem:[#allocation6 + $0xe0] sm:$0xff]  }
0x1271   :  { %v1541_v57 = vmul.f32 -1.442695, %v998_v0  ;;  %v996_v58 = vpop.f32.mrb[35].mxu0  ;;  %v1553_v0 = vld [vmem:[%s2492_s4 + $0x1] ss:$0 sm:$0xff] }
0x1272   :  { %v1542_v59 = vmul.f32 -1.442695, %v999_v55 }
0x1273   :  { %1877 = vpow2.f32 %v1541_v57 }
0x1274   :  { %1879 = vpow2.f32 %v1542_v59 }
0x1275   :  { %1881 = vtanh.f32 %v999_v55 }
0x127d   :  { %v1878_v20 = vpop.eup %1877 }
0x127e   :  { %v1880_v40 = vpop.eup %1879  ;;  %v1003_v21 = vadd.f32 1.0, %v1878_v20 }
0x127f   :  { %v1009_v22 = vadd.f32 1.0, %v1880_v40  ;;  %v1882_v27 = vpop.eup %1881  ;;  %v1767_v40 = vld [vmem:[#allocation6 + $0xf0] sm:$0xff]  }
0x1280   :  { %1883 = vrcp.f32 %v1003_v21  ;;  %v1768_v21 = vld [vmem:[#allocation6 + $0xf8] sm:$0xff]  }
0x1281   :  { %1885 = vrcp.f32 %v1009_v22  ;;  %v1563_v22 = vld [vmem:[%s2492_s4 + $0x2] ss:$0 sm:$0xff] }
0x128a   :  { %v1884_v38 = vpop.eup %1883 }
0x128b   :  { %v1886_v28 = vpop.eup %1885  ;;  %1014 = vrot.lane.b32.xlu1 %v1884_v38, %s1975_s1 }
0x128c   :  { %v1013_v39 = vsel %vm210_vm1, %v1886_v28, %v1882_v27 }
0x128d   :  { %1016 = vrot.lane.b32.xlu0 %v1013_v39, %s1975_s1 }
0x12fd   :  { %v1015_v7 = vpop.permute.xlu1 %1014 }
0x12fe   :  { %v1018_v9 = vmul.f32 %v1015_v7, %v953_v49  ;;  %v1762_v49 = vld [vmem:[#allocation6 + $0xc8] sm:$0xff]  }
0x12ff   :  { %v1017_v8 = vpop.permute.xlu0 %1016 }
0x1300   :  { %v1019_v10 = vmul.f32 %v1884_v38, %v1017_v8 }
0x1302   :  { %v1020_v11 = vadd.f32 %v1019_v10, %v1018_v9 }
0x1304   :  { %1887 = vtanh.f32 %v1020_v11 }
0x130e   :  { %v1888_v19 = vpop.eup %1887 }
0x130f   :  { %v1022_v63 = vmul.f32 %v1888_v19, %v1013_v39 }
0x1311   :  { %1023 = vrot.lane.b32.xlu1 %v1022_v63, %s1975_s1 }
0x1383   :  { %v1024_v44 = vpop.permute.xlu1 %1023 }
0x1384   :  { %v1025_v2 = vsel %vm210_vm1, %v1020_v11, %v1024_v44 }
0x1385   :  { %v1026_v45 = vpack.c.bf16 %v1025_v2, %v1025_v2 }
0x1387   :  { %1635 = vmatmul.mubr.bf16.vlgmr.msra.gmra.mrb[24].mxu1 %v1026_v45 }
0x1388   :  { %1674 = vmatprep.mubr.msk.bf16.mxu1 %vm1979_vm2, %v1978_v60  ;;  %1659 = vmatpush3.bf16.msra.mxu1 %v1753_v35 }
0x1389   :  { %1660 = vmatprep.subr.bf16.mxu1 %v1978_v60 }
0x138c   :  { %1661 = vmatpush3.bf16.msra.mxu1 %v1754_v3 }
0x138d   :  { %1662 = vmatprep.subr.bf16.mxu1 %v1978_v60 }
0x1390   :  { %1663 = vmatpush3.bf16.msra.mxu1 %v1755_v54 }
0x1391   :  { %1664 = vmatprep.subr.bf16.mxu1 %v1978_v60 }
0x1394   :  { %1665 = vmatpush3.bf16.msra.mxu1 %v1756_v32 }
0x1395   :  { %1666 = vmatprep.subr.bf16.mxu1 %v1978_v60 }
0x1398   :  { %1667 = vmatpush3.bf16.msra.mxu1 %v1757_v4 }
0x1399   :  { %1668 = vmatprep.subr.bf16.mxu1 %v1978_v60 }
0x139c   :  { %1669 = vmatpush3.bf16.msra.mxu1 %v1758_v25 }
0x139d   :  { %1670 = vmatprep.subr.bf16.mxu1 %v1978_v60 }
0x13a0   :  { %1671 = vmatpush3.bf16.msra.mxu1 %v1759_v48 }
0x13a1   :  { %1672 = vmatprep.subr.bf16.mxu1 %v1978_v60 }
0x13a4   :  { %1673 = vmatpush3.bf16.msra.mxu1 %v1760_v50 }
0x145a   :  { %v1132_v26 = vpop.f32.mrb[24].mxu1 }
0x145b   :  { %v1133_v12 = vadd.f32 %v1543_v5, %v1132_v26  ;;  %v1636_v13 = vpop.f32.mrb[25].mxu1 }
0x145c   :  { %v1135_v15 = vpop.f32.mrb[26].mxu1 }
0x145d   :  { %v1138_v29 = vmax.f32 %v1133_v12, 0.0  ;;  %v1637_v30 = vpop.f32.mrb[27].mxu1 }
0x145f   :  { %v1139_v33 = vpack.c.bf16 %v1138_v29, %v1138_v29 }
0x1461   :  { %1655 = vmatmul.mubr.bf16.vlgmr.msra.gmra.mrb[36].mxu0 %v1139_v33 }
0x1462   :  { %1694 = vmatprep.mubr.msk.bf16.mxu0 %vm1979_vm2, %v1978_v60  ;;  %1679 = vmatpush3.bf16.msra.mxu0 %v1761_v51 }
0x1463   :  { %1680 = vmatprep.subr.bf16.mxu0 %v1978_v60 }
0x1466   :  { %1681 = vmatpush3.bf16.msra.mxu0 %v1762_v49 }
0x1467   :  { %1682 = vmatprep.subr.bf16.mxu0 %v1978_v60 }
0x146a   :  { %1683 = vmatpush3.bf16.msra.mxu0 %v1763_v6 }
0x146b   :  { %1684 = vmatprep.subr.bf16.mxu0 %v1978_v60 }
0x146e   :  { %1685 = vmatpush3.bf16.msra.mxu0 %v1764_v42 }
0x146f   :  { %1686 = vmatprep.subr.bf16.mxu0 %v1978_v60 }
0x1472   :  { %1687 = vmatpush3.bf16.msra.mxu0 %v1765_v52 }
0x1473   :  { %1688 = vmatprep.subr.bf16.mxu0 %v1978_v60 }
0x1476   :  { %1689 = vmatpush3.bf16.msra.mxu0 %v1766_v43 }
0x1477   :  { %1690 = vmatprep.subr.bf16.mxu0 %v1978_v60 }
0x147a   :  { %1691 = vmatpush3.bf16.msra.mxu0 %v1767_v40 }
0x147b   :  { %1692 = vmatprep.subr.bf16.mxu0 %v1978_v60 }
0x147e   :  { %1693 = vmatpush3.bf16.msra.mxu0 %v1768_v21 }
0x1534   :  { %v1247_v53 = vpop.f32.mrb[36].mxu0 }
0x1535   :  { %v1248_v55 = vadd.f32 %v1553_v0, %v1247_v53  ;;  %v1656_v56 = vpop.f32.mrb[37].mxu0 }
0x1536   :  { %v1250_v57 = vpop.f32.mrb[38].mxu0 }
0x1537   :  { %v1253_v58 = vmax.f32 %v1248_v55, 0.0  ;;  %v1657_v59 = vpop.f32.mrb[39].mxu0 }
0x1539   :  { %v1254_v20 = vpack.c.bf16 %v1253_v58, %v1253_v58 }
0x153b   :  { %1675 = vmatmul.mubr.bf16.vlgmr.msra.gmra.mrb[28].mxu1 %v1254_v20 }
0x160e   :  { %v1362_v27 = vpop.f32.mrb[28].mxu1 }
0x160f   :  { %v1363_v38 = vadd.f32 %v1563_v22, %v1362_v27  ;;  %v1676_v28 = vpop.f32.mrb[29].mxu1 }
0x1610   :  { %v1365_v39 = vpop.f32.mrb[30].mxu1 }
0x1611   :  { %v1368_v23 = vmax.f32 %v1363_v38, 0.0  ;;  %v1677_v24 = vpop.f32.mrb[31].mxu1 }
0x1613   :  { %v1369_v46 = vpack.c.bf16 %v1368_v23, %v1368_v23 }
0x1615   :  { %1695 = vmatmul.mubr.bf16.vlgmr.msra.gmra.mrb[40].mxu0 %v1369_v46 }
0x16e8   :  { %v1477_v60 = vpop.f32.mrb[40].mxu0 }
0x16e9   :  { %v1478_v47 = vadd.f32 %v1573_v41, %v1477_v60  ;;  %v1696_v61 = vpop.f32.mrb[41].mxu0 }
0x16ea   :  { %v1480_v62 = vpop.f32.mrb[42].mxu0 }
0x16eb   :  { %1483 = vst [vmem:[#allocation8] sm:$0xff] %v1478_v47  ;;  %v1697_v7 = vpop.f32.mrb[43].mxu0 }
0x16ec   :  { %1954 = shalt.err (!%p1951_p6)
}
0x16ed   :  { %s1955_s4 = scalar_lea.hbm %s2493_s5, 128 }
0x16ee   :  { %p1956_p7 = scmp.ne.s32.totalorder %s2493_s5, %s1955_s4  ;;  %p1959_p8 = scmp.lt.u32.totalorder %s1955_s4, %s2493_s5 }
0x16f0   :  { %p1961_p9 = pnand %p1959_p8, %p1956_p7 }
0x16f2   :  { %1964 = shalt.err (!%p1961_p9)
}
0x16f3   :  { %1493 = dma.vmem_to_hbm [thread:$0]  %s1491_s22, 128, %s2493_s5, [#allocation5]  }
0x16f4   :  { %1969 = dma.done.wait [#allocation5], 128  }
0x16f5   :  { %1970 = vsyncadd [#allocation5], 4294967168 }
0x16f6   :  { %1497 = vsyncpa [#allocation4], 1 }
0x16f7   :  { %1498 = vsyncpa [#allocation7], 1 }
0x16f8   :  { %1499 = vsyncpa [#allocation5], 1 }

</bundles_post_ra>
